<compile_context>
chip_gen: v7x
topology: tpu7x:2x2x1
jax: 0.10.0
libtpu: 0.0.40
codegen_flags: <defaults>
</compile_context>

<pallas_src>
import functools
import math

import numpy as np
import jax
import jax.numpy as jnp
from jax.experimental import pallas as pl
from jax.experimental.pallas import tpu as pltpu

EPS = 1e-5
ALPHA = 0.2

B = 2
NOISE = 16
CLASSES = 4
FC1_FILTERS = 32
FC2_FILTERS = 8
OUTPUT_SIZE = 32
S = OUTPUT_SIZE // 4                                           # 8
FC2_OUT = FC2_FILTERS * OUTPUT_SIZE // 4 * OUTPUT_SIZE // 4    # 512 (PyTorch precedence)
CONV1_FILTERS = 8
CONV2_FILTERS = 4

H1, W1 = S, S              # conv1 input spatial   8x8
H2, W2 = S - 2, S - 2      # conv1 output spatial  6x6
H3, W3 = S - 4, S - 4      # conv2 output spatial  4x4

L_FC2 = FC2_FILTERS * H1 * W1      # 512 lanes (NCHW-flat)
L_C1 = CONV1_FILTERS * H2 * W2     # 288 lanes
L_C2 = CONV2_FILTERS * H3 * W3     # 64 lanes

# 128-aligned lane offsets of each layer's packed (bias, gamma, beta) segment.
OFF_FC1 = 0
OFF_FC2 = 128
OFF_C1 = OFF_FC2 + L_FC2           # 640
OFF_C2 = 1024
VEC_LANES = OFF_C2 + 128           # 1152 = 9 * 128


# ---------------------------------------------------------------------------
# Single fused Pallas kernel
# ---------------------------------------------------------------------------
def generator_kernel(x_ref, t_ref, w1x_ref, w1t_ref, w2_ref, g1_ref, g2_ref,
                     vec_ref, ef2_ref, ec1_ref, ec2_ref, o_ref,
                     *, alpha, inv_fc2, inv_c1, inv_c2):
    bf16 = jnp.bfloat16

    def dot(a, b):
        # bf16 operands, f32 accumulate (MXU-native on v5e/v6e/v7x).
        return jnp.dot(a.astype(bf16), b, preferred_element_type=jnp.float32)

    def leaky(y):
        return jnp.where(y >= 0, y, alpha * y)

    def group_bn(y, e, inv_count, gamma, beta):
        # Training-mode BN where each channel owns a contiguous lane group.
        # One MXU hop: [sum_b(y); sum_b(y^2)] @ E gives group-broadcast sums;
        # scale by 1/count, then var = E[y^2] - mean^2 (clamped >= 0).
        s1 = jnp.sum(y, axis=0, keepdims=True)                 # (1, L)
        s2 = jnp.sum(y * y, axis=0, keepdims=True)             # (1, L)
        red = dot(jnp.concatenate([s1, s2], axis=0), e) * inv_count   # (2, L)
        mean = red[0:1, :]
        var = jnp.maximum(red[1:2, :] - mean * mean, 0.0)
        return gamma * (y - mean) * jax.lax.rsqrt(var + EPS) + beta

    # Packed per-layer (bias, gamma, beta) vectors, static 128-aligned slices.
    v1 = vec_ref[:, OFF_FC1:OFF_FC1 + FC1_FILTERS]             # (3, 32)
    v2 = vec_ref[:, OFF_FC2:OFF_FC2 + L_FC2]                   # (3, 512)
    vc1 = vec_ref[:, OFF_C1:OFF_C1 + L_C1]                     # (3, 288)
    vc2 = vec_ref[:, OFF_C2:OFF_C2 + L_C2]                     # (3, 64)

    # ---- fc1 (concat folded into split matmul) -> leaky -> bn_fc1 (batch stats)
    y1 = dot(x_ref[...], w1x_ref[...]) + dot(t_ref[...], w1t_ref[...]) + v1[0:1, :]
    a1 = leaky(y1)
    m1 = jnp.mean(a1, axis=0, keepdims=True)
    c1 = a1 - m1
    var1 = jnp.mean(c1 * c1, axis=0, keepdims=True)
    h1 = v1[1:2, :] * c1 * jax.lax.rsqrt(var1 + EPS) + v1[2:3, :]      # (B, 32)

    # ---- fc2 -> leaky -> bn_fc2 (per-channel over batch+spatial), NCHW-flat lanes
    y2 = leaky(dot(h1, w2_ref[...]) + v2[0:1, :])                      # (B, 512)
    h2 = group_bn(y2, ef2_ref[...], inv_fc2, v2[1:2, :], v2[2:3, :])

    # ---- conv1 (Toeplitz matmul) -> bn_conv1 -> leaky
    y3 = dot(h2, g1_ref[...]) + vc1[0:1, :]                            # (B, 288)
    h3 = leaky(group_bn(y3, ec1_ref[...], inv_c1, vc1[1:2, :], vc1[2:3, :]))

    # ---- conv2 (Toeplitz matmul) -> bn_conv2 -> leaky -> tanh
    y4 = dot(h3, g2_ref[...]) + vc2[0:1, :]                            # (B, 64)
    h4 = leaky(group_bn(y4, ec2_ref[...], inv_c2, vc2[1:2, :], vc2[2:3, :]))
    o_ref[...] = jnp.tanh(h4)                                          # NCHW-flat


# ---------------------------------------------------------------------------
# Forward wrapper: one pallas_call, one metadata-only reshape
# ---------------------------------------------------------------------------
def generator_forward(params, x, target, alpha=ALPHA):
    b = x.shape[0]
    kern = functools.partial(
        generator_kernel, alpha=alpha,
        inv_fc2=1.0 / (b * H1 * W1),
        inv_c1=1.0 / (b * H2 * W2),
        inv_c2=1.0 / (b * H3 * W3))

    args = (x, target,
            params["fc1_wx"], params["fc1_wt"], params["fc2_wT"],
            params["g1"], params["g2"], params["vec"],
            params["E_fc2"], params["E_c1"], params["E_c2"])

    out_flat = pl.pallas_call(
        kern,
        out_shape=jax.ShapeDtypeStruct((b, L_C2), jnp.float32),
        in_specs=[pl.BlockSpec(memory_space=pltpu.MemorySpace.VMEM)] * len(args),
        out_specs=pl.BlockSpec(memory_space=pltpu.MemorySpace.VMEM),
    )(*args)

    # kernel output is already NCHW-flat -> pure dim-split reshape, no transpose.
    out = out_flat.reshape(b, CONV2_FILTERS, H3, W3)
    return out, target


# ---------------------------------------------------------------------------
# Host-side parameter construction / preprocessing (done once, not per call)
# ---------------------------------------------------------------------------
def kaiming_normal(key, shape, fan_in, a):
    gain = math.sqrt(2.0 / (1.0 + a * a))
    std = gain / math.sqrt(fan_in)
    return std * jax.random.normal(key, shape, dtype=jnp.float32)


def toeplitz_conv(w, cin, cout, hin, win):
    # w: (cout, cin, 3, 3) PyTorch layout. Returns the dense matrix G such that
    # valid 3x3 conv in NCHW-flat layout is  Y[b, :] = X[b, :] @ G.
    hout, wout = hin - 2, win - 2
    g = np.zeros((cin * hin * win, cout * hout * wout), np.float32)
    for co in range(cout):
        for ci in range(cin):
            for kh in range(3):
                for kw in range(3):
                    val = w[co, ci, kh, kw]
                    for oh in range(hout):
                        row = ci * hin * win + (oh + kh) * win + kw
                        col = co * hout * wout + oh * wout
                        for ow in range(wout):
                            g[row + ow, col + ow] = val
    return g


def block_indicator(l, c):
    # 0/1 matrix: E[i, j] = 1 iff lanes i, j belong to the same channel group.
    gsize = l // c
    idx = np.arange(l) // gsize
    return (idx[:, None] == idx[None, :]).astype(np.float32)


def make_params(key):
    ks = jax.random.split(key, 8)
    # raw weights (same generation scheme as the original PyTorch-style init)
    w1 = kaiming_normal(ks[0], (FC1_FILTERS, NOISE + CLASSES), NOISE + CLASSES, ALPHA)
    b1 = jax.random.uniform(ks[1], (FC1_FILTERS,), jnp.float32,
                            -1.0 / math.sqrt(NOISE + CLASSES), 1.0 / math.sqrt(NOISE + CLASSES))
    w2 = kaiming_normal(ks[2], (FC2_OUT, FC1_FILTERS), FC1_FILTERS, ALPHA)
    b2 = jax.random.uniform(ks[3], (FC2_OUT,), jnp.float32,
                            -1.0 / math.sqrt(FC1_FILTERS), 1.0 / math.sqrt(FC1_FILTERS))
    wc1 = kaiming_normal(ks[4], (CONV1_FILTERS, FC2_FILTERS, 3, 3), FC2_FILTERS * 9, ALPHA)
    bc1 = jax.random.uniform(ks[5], (CONV1_FILTERS,), jnp.float32,
                             -1.0 / math.sqrt(FC2_FILTERS * 9), 1.0 / math.sqrt(FC2_FILTERS * 9))
    wc2 = kaiming_normal(ks[6], (CONV2_FILTERS, CONV1_FILTERS, 3, 3), CONV1_FILTERS * 9, ALPHA)
    bc2 = jax.random.uniform(ks[7], (CONV2_FILTERS,), jnp.float32,
                             -1.0 / math.sqrt(CONV1_FILTERS * 9), 1.0 / math.sqrt(CONV1_FILTERS * 9))

    w1n, b1n = np.asarray(w1), np.asarray(b1)
    w2n, b2n = np.asarray(w2), np.asarray(b2)
    wc1n, bc1n = np.asarray(wc1), np.asarray(bc1)
    wc2n, bc2n = np.asarray(wc2), np.asarray(bc2)

    bf = lambda a: jnp.asarray(np.ascontiguousarray(a), dtype=jnp.bfloat16)

    p = {}
    # fc1: split W^T so the [x, target] concat becomes two matmuls in-kernel.
    p["fc1_wx"] = bf(w1n[:, :NOISE].T)                       # (16, 32)  bf16
    p["fc1_wt"] = bf(w1n[:, NOISE:].T)                       # (4, 32)   bf16
    # fc2: columns are already in NCHW-flat order (c*S*S + i*S + j).
    p["fc2_wT"] = bf(w2n.T)                                  # (32, 512) bf16
    # convolutions as precomputed Toeplitz matmuls.
    p["g1"] = bf(toeplitz_conv(wc1n, FC2_FILTERS, CONV1_FILTERS, H1, W1))    # (512, 288)
    p["g2"] = bf(toeplitz_conv(wc2n, CONV1_FILTERS, CONV2_FILTERS, H2, W2))  # (288, 64)

    # packed (bias, gamma, beta) vectors at 128-aligned lane offsets (f32).
    vec = np.zeros((3, VEC_LANES), np.float32)
    vec[0, OFF_FC1:OFF_FC1 + FC1_FILTERS] = b1n
    vec[1, OFF_FC1:OFF_FC1 + FC1_FILTERS] = 1.0                              # gamma
    vec[0, OFF_FC2:OFF_FC2 + L_FC2] = b2n
    vec[1, OFF_FC2:OFF_FC2 + L_FC2] = np.repeat(np.ones(FC2_FILTERS, np.float32), H1 * W1)
    vec[0, OFF_C1:OFF_C1 + L_C1] = np.repeat(bc1n, H2 * W2)
    vec[1, OFF_C1:OFF_C1 + L_C1] = np.repeat(np.ones(CONV1_FILTERS, np.float32), H2 * W2)
    vec[0, OFF_C2:OFF_C2 + L_C2] = np.repeat(bc2n, H3 * W3)
    vec[1, OFF_C2:OFF_C2 + L_C2] = np.repeat(np.ones(CONV2_FILTERS, np.float32), H3 * W3)
    # betas (row 2) stay zero (PyTorch default init).
    p["vec"] = jnp.asarray(vec)                                              # (3, 1152) f32

    # 0/1 block-indicator matrices for one-hop BN statistics (bf16, exact).
    p["E_fc2"] = bf(block_indicator(L_FC2, FC2_FILTERS))                     # (512, 512)
    p["E_c1"] = bf(block_indicator(L_C1, CONV1_FILTERS))                     # (288, 288)
    p["E_c2"] = bf(block_indicator(L_C2, CONV2_FILTERS))                     # (64, 64)
    return p


if __name__ == "__main__":
    # TODO(synk): the literal PyTorch forward never reshapes before Conv2d (it would
    # raise on a 2-D tensor with in_channels=fc2_out_filters); we follow the evident
    # GTN intent: view the fc2 output as (B, fc2_filters, S, S), apply bn_fc2 per
    # channel over batch+spatial, and run conv1 with fc2_filters input channels.
    key = jax.random.PRNGKey(0)
    k_params, k_x = jax.random.split(key)
    params = make_params(k_params)

    x = jax.random.normal(k_x, (B, NOISE), dtype=jnp.float32)
    target = jax.nn.one_hot(jnp.array([1, 3]), CLASSES, dtype=jnp.float32)

    out, tgt = jax.jit(generator_forward)(params, x, target)
    out = jax.block_until_ready(out)

    assert out.shape == (B, CONV2_FILTERS, H3, W3), out.shape      # (2, 4, 4, 4) NCHW
    assert tgt.shape == (B, CLASSES)
    assert bool(jnp.all(jnp.isfinite(out)))
    assert bool(jnp.all(jnp.abs(out) <= 1.0))                      # tanh output range

    print("KERNEL_OK")
</pallas_src>

<mosaic_0001>
module attributes {stable_mosaic.version = 11 : i64} {
  func.func @generator_kernel(%arg0: memref<2x16xf32, #tpu.memory_space<vmem>>, %arg1: memref<2x4xf32, #tpu.memory_space<vmem>>, %arg2: memref<16x32xbf16, #tpu.memory_space<vmem>>, %arg3: memref<4x32xbf16, #tpu.memory_space<vmem>>, %arg4: memref<32x512xbf16, #tpu.memory_space<vmem>>, %arg5: memref<512x288xbf16, #tpu.memory_space<vmem>>, %arg6: memref<288x64xbf16, #tpu.memory_space<vmem>>, %arg7: memref<3x1152xf32, #tpu.memory_space<vmem>>, %arg8: memref<512x512xbf16, #tpu.memory_space<vmem>>, %arg9: memref<288x288xbf16, #tpu.memory_space<vmem>>, %arg10: memref<64x64xbf16, #tpu.memory_space<vmem>>, %arg11: memref<2x64xf32, #tpu.memory_space<vmem>>) attributes {dimension_semantics = [], scalar_prefetch = 0 : i64, scratch_operands = 0 : i64, tpu.core_type = #tpu.core_type<tc>} {
    %c0 = arith.constant 0 : index
    %c0_0 = arith.constant 0 : index
    %0 = vector.load %arg7[%c0, %c0_0] : memref<3x1152xf32, #tpu.memory_space<vmem>>, vector<3x32xf32>
    %c0_1 = arith.constant 0 : index
    %c128 = arith.constant 128 : index
    %1 = vector.load %arg7[%c0_1, %c128] : memref<3x1152xf32, #tpu.memory_space<vmem>>, vector<3x512xf32>
    %c0_2 = arith.constant 0 : index
    %c640 = arith.constant 640 : index
    %2 = vector.load %arg7[%c0_2, %c640] : memref<3x1152xf32, #tpu.memory_space<vmem>>, vector<3x288xf32>
    %c0_3 = arith.constant 0 : index
    %c1024 = arith.constant 1024 : index
    %3 = vector.load %arg7[%c0_3, %c1024] : memref<3x1152xf32, #tpu.memory_space<vmem>>, vector<3x64xf32>
    %c0_4 = arith.constant 0 : index
    %c0_5 = arith.constant 0 : index
    %4 = vector.load %arg0[%c0_4, %c0_5] : memref<2x16xf32, #tpu.memory_space<vmem>>, vector<2x16xf32>
    %c0_6 = arith.constant 0 : index
    %c0_7 = arith.constant 0 : index
    %5 = vector.load %arg2[%c0_6, %c0_7] : memref<16x32xbf16, #tpu.memory_space<vmem>>, vector<16x32xbf16>
    %6 = arith.truncf %4 : vector<2x16xf32> to vector<2x16xbf16>
    %cst = arith.constant dense<0.000000e+00> : vector<2x32xf32>
    %7 = tpu.matmul %6, %5, %cst {dimension_numbers = #tpu.dot_dimension_numbers<[1], [0], [0], [1], [0, 0, 1, 1], [], []>} : vector<2x16xbf16>, vector<16x32xbf16>, vector<2x32xf32> -> vector<2x32xf32>
    %c0_8 = arith.constant 0 : index
    %c0_9 = arith.constant 0 : index
    %8 = vector.load %arg1[%c0_8, %c0_9] : memref<2x4xf32, #tpu.memory_space<vmem>>, vector<2x4xf32>
    %c0_10 = arith.constant 0 : index
    %c0_11 = arith.constant 0 : index
    %9 = vector.load %arg3[%c0_10, %c0_11] : memref<4x32xbf16, #tpu.memory_space<vmem>>, vector<4x32xbf16>
    %10 = arith.truncf %8 : vector<2x4xf32> to vector<2x4xbf16>
    %cst_12 = arith.constant dense<0.000000e+00> : vector<2x32xf32>
    %11 = tpu.matmul %10, %9, %cst_12 {dimension_numbers = #tpu.dot_dimension_numbers<[1], [0], [0], [1], [0, 0, 1, 1], [], []>} : vector<2x4xbf16>, vector<4x32xbf16>, vector<2x32xf32> -> vector<2x32xf32>
    %12 = arith.addf %7, %11 : vector<2x32xf32>
    %13 = vector.extract_strided_slice %0 {offsets = [0, 0], sizes = [1, 32], strides = [1, 1]} : vector<3x32xf32> to vector<1x32xf32>
    %14 = vector.broadcast %13 : vector<1x32xf32> to vector<2x32xf32>
    %15 = arith.addf %12, %14 : vector<2x32xf32>
    %cst_13 = arith.constant 0.000000e+00 : f32
    %16 = vector.broadcast %cst_13 : f32 to vector<2x32xf32>
    %17 = arith.cmpf oge, %15, %16 : vector<2x32xf32>
    %cst_14 = arith.constant 2.000000e-01 : f32
    %18 = vector.broadcast %cst_14 : f32 to vector<2x32xf32>
    %19 = arith.mulf %18, %15 : vector<2x32xf32>
    %20 = arith.select %17, %15, %19 : vector<2x32xi1>, vector<2x32xf32>
    %cst_15 = arith.constant dense<0.000000e+00> : vector<32xf32>
    %21 = vector.multi_reduction <add>, %20, %cst_15 [0] : vector<2x32xf32> to vector<32xf32>
    %22 = vector.shape_cast %21 : vector<32xf32> to vector<1x32xf32>
    %cst_16 = arith.constant 2.000000e+00 : f32
    %23 = vector.broadcast %cst_16 : f32 to vector<1x32xf32>
    %24 = arith.divf %22, %23 : vector<1x32xf32>
    %25 = vector.broadcast %24 : vector<1x32xf32> to vector<2x32xf32>
    %26 = arith.subf %20, %25 : vector<2x32xf32>
    %27 = arith.mulf %26, %26 : vector<2x32xf32>
    %cst_17 = arith.constant dense<0.000000e+00> : vector<32xf32>
    %28 = vector.multi_reduction <add>, %27, %cst_17 [0] : vector<2x32xf32> to vector<32xf32>
    %29 = vector.shape_cast %28 : vector<32xf32> to vector<1x32xf32>
    %cst_18 = arith.constant 2.000000e+00 : f32
    %30 = vector.broadcast %cst_18 : f32 to vector<1x32xf32>
    %31 = arith.divf %29, %30 : vector<1x32xf32>
    %32 = vector.extract_strided_slice %0 {offsets = [1, 0], sizes = [1, 32], strides = [1, 1]} : vector<3x32xf32> to vector<1x32xf32>
    %33 = vector.broadcast %32 : vector<1x32xf32> to vector<2x32xf32>
    %34 = arith.mulf %33, %26 : vector<2x32xf32>
    %cst_19 = arith.constant 9.99999974E-6 : f32
    %35 = vector.broadcast %cst_19 : f32 to vector<1x32xf32>
    %36 = arith.addf %31, %35 : vector<1x32xf32>
    %37 = math.rsqrt %36 : vector<1x32xf32>
    %38 = vector.broadcast %37 : vector<1x32xf32> to vector<2x32xf32>
    %39 = arith.mulf %34, %38 : vector<2x32xf32>
    %40 = vector.extract_strided_slice %0 {offsets = [2, 0], sizes = [1, 32], strides = [1, 1]} : vector<3x32xf32> to vector<1x32xf32>
    %41 = vector.broadcast %40 : vector<1x32xf32> to vector<2x32xf32>
    %42 = arith.addf %39, %41 : vector<2x32xf32>
    %c0_20 = arith.constant 0 : index
    %c0_21 = arith.constant 0 : index
    %43 = vector.load %arg4[%c0_20, %c0_21] : memref<32x512xbf16, #tpu.memory_space<vmem>>, vector<32x512xbf16>
    %44 = arith.truncf %42 : vector<2x32xf32> to vector<2x32xbf16>
    %cst_22 = arith.constant dense<0.000000e+00> : vector<2x512xf32>
    %45 = tpu.matmul %44, %43, %cst_22 {dimension_numbers = #tpu.dot_dimension_numbers<[1], [0], [0], [1], [0, 0, 1, 1], [], []>} : vector<2x32xbf16>, vector<32x512xbf16>, vector<2x512xf32> -> vector<2x512xf32>
    %46 = vector.extract_strided_slice %1 {offsets = [0, 0], sizes = [1, 512], strides = [1, 1]} : vector<3x512xf32> to vector<1x512xf32>
    %47 = vector.broadcast %46 : vector<1x512xf32> to vector<2x512xf32>
    %48 = arith.addf %45, %47 : vector<2x512xf32>
    %cst_23 = arith.constant 0.000000e+00 : f32
    %49 = vector.broadcast %cst_23 : f32 to vector<2x512xf32>
    %50 = arith.cmpf oge, %48, %49 : vector<2x512xf32>
    %cst_24 = arith.constant 2.000000e-01 : f32
    %51 = vector.broadcast %cst_24 : f32 to vector<2x512xf32>
    %52 = arith.mulf %51, %48 : vector<2x512xf32>
    %53 = arith.select %50, %48, %52 : vector<2x512xi1>, vector<2x512xf32>
    %c0_25 = arith.constant 0 : index
    %c0_26 = arith.constant 0 : index
    %54 = vector.load %arg8[%c0_25, %c0_26] : memref<512x512xbf16, #tpu.memory_space<vmem>>, vector<512x512xbf16>
    %55 = vector.extract_strided_slice %1 {offsets = [1, 0], sizes = [1, 512], strides = [1, 1]} : vector<3x512xf32> to vector<1x512xf32>
    %56 = vector.extract_strided_slice %1 {offsets = [2, 0], sizes = [1, 512], strides = [1, 1]} : vector<3x512xf32> to vector<1x512xf32>
    %cst_27 = arith.constant dense<0.000000e+00> : vector<512xf32>
    %57 = vector.multi_reduction <add>, %53, %cst_27 [0] : vector<2x512xf32> to vector<512xf32>
    %58 = vector.shape_cast %57 : vector<512xf32> to vector<1x512xf32>
    %59 = arith.mulf %53, %53 : vector<2x512xf32>
    %cst_28 = arith.constant dense<0.000000e+00> : vector<512xf32>
    %60 = vector.multi_reduction <add>, %59, %cst_28 [0] : vector<2x512xf32> to vector<512xf32>
    %61 = vector.shape_cast %60 : vector<512xf32> to vector<1x512xf32>
    %62 = tpu.concatenate %58, %61 in 0 : vector<1x512xf32>, vector<1x512xf32> -> vector<2x512xf32>
    %63 = arith.truncf %62 : vector<2x512xf32> to vector<2x512xbf16>
    %cst_29 = arith.constant dense<0.000000e+00> : vector<2x512xf32>
    %64 = tpu.matmul %63, %54, %cst_29 {dimension_numbers = #tpu.dot_dimension_numbers<[1], [0], [0], [1], [0, 0, 1, 1], [], []>} : vector<2x512xbf16>, vector<512x512xbf16>, vector<2x512xf32> -> vector<2x512xf32>
    %cst_30 = arith.constant 7.812500e-03 : f32
    %65 = vector.broadcast %cst_30 : f32 to vector<2x512xf32>
    %66 = arith.mulf %64, %65 : vector<2x512xf32>
    %67 = vector.extract_strided_slice %66 {offsets = [0, 0], sizes = [1, 512], strides = [1, 1]} : vector<2x512xf32> to vector<1x512xf32>
    %68 = vector.extract_strided_slice %66 {offsets = [1, 0], sizes = [1, 512], strides = [1, 1]} : vector<2x512xf32> to vector<1x512xf32>
    %69 = arith.mulf %67, %67 : vector<1x512xf32>
    %70 = arith.subf %68, %69 : vector<1x512xf32>
    %cst_31 = arith.constant 0.000000e+00 : f32
    %71 = vector.broadcast %cst_31 : f32 to vector<1x512xf32>
    %72 = arith.maximumf %70, %71 : vector<1x512xf32>
    %73 = vector.broadcast %67 : vector<1x512xf32> to vector<2x512xf32>
    %74 = arith.subf %53, %73 : vector<2x512xf32>
    %75 = vector.broadcast %55 : vector<1x512xf32> to vector<2x512xf32>
    %76 = arith.mulf %75, %74 : vector<2x512xf32>
    %cst_32 = arith.constant 9.99999974E-6 : f32
    %77 = vector.broadcast %cst_32 : f32 to vector<1x512xf32>
    %78 = arith.addf %72, %77 : vector<1x512xf32>
    %79 = math.rsqrt %78 : vector<1x512xf32>
    %80 = vector.broadcast %79 : vector<1x512xf32> to vector<2x512xf32>
    %81 = arith.mulf %76, %80 : vector<2x512xf32>
    %82 = vector.broadcast %56 : vector<1x512xf32> to vector<2x512xf32>
    %83 = arith.addf %81, %82 : vector<2x512xf32>
    %c0_33 = arith.constant 0 : index
    %c0_34 = arith.constant 0 : index
    %84 = vector.load %arg5[%c0_33, %c0_34] : memref<512x288xbf16, #tpu.memory_space<vmem>>, vector<512x288xbf16>
    %85 = arith.truncf %83 : vector<2x512xf32> to vector<2x512xbf16>
    %cst_35 = arith.constant dense<0.000000e+00> : vector<2x288xf32>
    %86 = tpu.matmul %85, %84, %cst_35 {dimension_numbers = #tpu.dot_dimension_numbers<[1], [0], [0], [1], [0, 0, 1, 1], [], []>} : vector<2x512xbf16>, vector<512x288xbf16>, vector<2x288xf32> -> vector<2x288xf32>
    %87 = vector.extract_strided_slice %2 {offsets = [0, 0], sizes = [1, 288], strides = [1, 1]} : vector<3x288xf32> to vector<1x288xf32>
    %88 = vector.broadcast %87 : vector<1x288xf32> to vector<2x288xf32>
    %89 = arith.addf %86, %88 : vector<2x288xf32>
    %c0_36 = arith.constant 0 : index
    %c0_37 = arith.constant 0 : index
    %90 = vector.load %arg9[%c0_36, %c0_37] : memref<288x288xbf16, #tpu.memory_space<vmem>>, vector<288x288xbf16>
    %91 = vector.extract_strided_slice %2 {offsets = [1, 0], sizes = [1, 288], strides = [1, 1]} : vector<3x288xf32> to vector<1x288xf32>
    %92 = vector.extract_strided_slice %2 {offsets = [2, 0], sizes = [1, 288], strides = [1, 1]} : vector<3x288xf32> to vector<1x288xf32>
    %cst_38 = arith.constant dense<0.000000e+00> : vector<288xf32>
    %93 = vector.multi_reduction <add>, %89, %cst_38 [0] : vector<2x288xf32> to vector<288xf32>
    %94 = vector.shape_cast %93 : vector<288xf32> to vector<1x288xf32>
    %95 = arith.mulf %89, %89 : vector<2x288xf32>
    %cst_39 = arith.constant dense<0.000000e+00> : vector<288xf32>
    %96 = vector.multi_reduction <add>, %95, %cst_39 [0] : vector<2x288xf32> to vector<288xf32>
    %97 = vector.shape_cast %96 : vector<288xf32> to vector<1x288xf32>
    %98 = tpu.concatenate %94, %97 in 0 : vector<1x288xf32>, vector<1x288xf32> -> vector<2x288xf32>
    %99 = arith.truncf %98 : vector<2x288xf32> to vector<2x288xbf16>
    %cst_40 = arith.constant dense<0.000000e+00> : vector<2x288xf32>
    %100 = tpu.matmul %99, %90, %cst_40 {dimension_numbers = #tpu.dot_dimension_numbers<[1], [0], [0], [1], [0, 0, 1, 1], [], []>} : vector<2x288xbf16>, vector<288x288xbf16>, vector<2x288xf32> -> vector<2x288xf32>
    %cst_41 = arith.constant 0.013888889 : f32
    %101 = vector.broadcast %cst_41 : f32 to vector<2x288xf32>
    %102 = arith.mulf %100, %101 : vector<2x288xf32>
    %103 = vector.extract_strided_slice %102 {offsets = [0, 0], sizes = [1, 288], strides = [1, 1]} : vector<2x288xf32> to vector<1x288xf32>
    %104 = vector.extract_strided_slice %102 {offsets = [1, 0], sizes = [1, 288], strides = [1, 1]} : vector<2x288xf32> to vector<1x288xf32>
    %105 = arith.mulf %103, %103 : vector<1x288xf32>
    %106 = arith.subf %104, %105 : vector<1x288xf32>
    %cst_42 = arith.constant 0.000000e+00 : f32
    %107 = vector.broadcast %cst_42 : f32 to vector<1x288xf32>
    %108 = arith.maximumf %106, %107 : vector<1x288xf32>
    %109 = vector.broadcast %103 : vector<1x288xf32> to vector<2x288xf32>
    %110 = arith.subf %89, %109 : vector<2x288xf32>
    %111 = vector.broadcast %91 : vector<1x288xf32> to vector<2x288xf32>
    %112 = arith.mulf %111, %110 : vector<2x288xf32>
    %cst_43 = arith.constant 9.99999974E-6 : f32
    %113 = vector.broadcast %cst_43 : f32 to vector<1x288xf32>
    %114 = arith.addf %108, %113 : vector<1x288xf32>
    %115 = math.rsqrt %114 : vector<1x288xf32>
    %116 = vector.broadcast %115 : vector<1x288xf32> to vector<2x288xf32>
    %117 = arith.mulf %112, %116 : vector<2x288xf32>
    %118 = vector.broadcast %92 : vector<1x288xf32> to vector<2x288xf32>
    %119 = arith.addf %117, %118 : vector<2x288xf32>
    %cst_44 = arith.constant 0.000000e+00 : f32
    %120 = vector.broadcast %cst_44 : f32 to vector<2x288xf32>
    %121 = arith.cmpf oge, %119, %120 : vector<2x288xf32>
    %cst_45 = arith.constant 2.000000e-01 : f32
    %122 = vector.broadcast %cst_45 : f32 to vector<2x288xf32>
    %123 = arith.mulf %122, %119 : vector<2x288xf32>
    %124 = arith.select %121, %119, %123 : vector<2x288xi1>, vector<2x288xf32>
    %c0_46 = arith.constant 0 : index
    %c0_47 = arith.constant 0 : index
    %125 = vector.load %arg6[%c0_46, %c0_47] : memref<288x64xbf16, #tpu.memory_space<vmem>>, vector<288x64xbf16>
    %126 = arith.truncf %124 : vector<2x288xf32> to vector<2x288xbf16>
    %cst_48 = arith.constant dense<0.000000e+00> : vector<2x64xf32>
    %127 = tpu.matmul %126, %125, %cst_48 {dimension_numbers = #tpu.dot_dimension_numbers<[1], [0], [0], [1], [0, 0, 1, 1], [], []>} : vector<2x288xbf16>, vector<288x64xbf16>, vector<2x64xf32> -> vector<2x64xf32>
    %128 = vector.extract_strided_slice %3 {offsets = [0, 0], sizes = [1, 64], strides = [1, 1]} : vector<3x64xf32> to vector<1x64xf32>
    %129 = vector.broadcast %128 : vector<1x64xf32> to vector<2x64xf32>
    %130 = arith.addf %127, %129 : vector<2x64xf32>
    %c0_49 = arith.constant 0 : index
    %c0_50 = arith.constant 0 : index
    %131 = vector.load %arg10[%c0_49, %c0_50] : memref<64x64xbf16, #tpu.memory_space<vmem>>, vector<64x64xbf16>
    %132 = vector.extract_strided_slice %3 {offsets = [1, 0], sizes = [1, 64], strides = [1, 1]} : vector<3x64xf32> to vector<1x64xf32>
    %133 = vector.extract_strided_slice %3 {offsets = [2, 0], sizes = [1, 64], strides = [1, 1]} : vector<3x64xf32> to vector<1x64xf32>
    %cst_51 = arith.constant dense<0.000000e+00> : vector<64xf32>
    %134 = vector.multi_reduction <add>, %130, %cst_51 [0] : vector<2x64xf32> to vector<64xf32>
    %135 = vector.shape_cast %134 : vector<64xf32> to vector<1x64xf32>
    %136 = arith.mulf %130, %130 : vector<2x64xf32>
    %cst_52 = arith.constant dense<0.000000e+00> : vector<64xf32>
    %137 = vector.multi_reduction <add>, %136, %cst_52 [0] : vector<2x64xf32> to vector<64xf32>
    %138 = vector.shape_cast %137 : vector<64xf32> to vector<1x64xf32>
    %139 = tpu.concatenate %135, %138 in 0 : vector<1x64xf32>, vector<1x64xf32> -> vector<2x64xf32>
    %140 = arith.truncf %139 : vector<2x64xf32> to vector<2x64xbf16>
    %cst_53 = arith.constant dense<0.000000e+00> : vector<2x64xf32>
    %141 = tpu.matmul %140, %131, %cst_53 {dimension_numbers = #tpu.dot_dimension_numbers<[1], [0], [0], [1], [0, 0, 1, 1], [], []>} : vector<2x64xbf16>, vector<64x64xbf16>, vector<2x64xf32> -> vector<2x64xf32>
    %cst_54 = arith.constant 3.125000e-02 : f32
    %142 = vector.broadcast %cst_54 : f32 to vector<2x64xf32>
    %143 = arith.mulf %141, %142 : vector<2x64xf32>
    %144 = vector.extract_strided_slice %143 {offsets = [0, 0], sizes = [1, 64], strides = [1, 1]} : vector<2x64xf32> to vector<1x64xf32>
    %145 = vector.extract_strided_slice %143 {offsets = [1, 0], sizes = [1, 64], strides = [1, 1]} : vector<2x64xf32> to vector<1x64xf32>
    %146 = arith.mulf %144, %144 : vector<1x64xf32>
    %147 = arith.subf %145, %146 : vector<1x64xf32>
    %cst_55 = arith.constant 0.000000e+00 : f32
    %148 = vector.broadcast %cst_55 : f32 to vector<1x64xf32>
    %149 = arith.maximumf %147, %148 : vector<1x64xf32>
    %150 = vector.broadcast %144 : vector<1x64xf32> to vector<2x64xf32>
    %151 = arith.subf %130, %150 : vector<2x64xf32>
    %152 = vector.broadcast %132 : vector<1x64xf32> to vector<2x64xf32>
    %153 = arith.mulf %152, %151 : vector<2x64xf32>
    %cst_56 = arith.constant 9.99999974E-6 : f32
    %154 = vector.broadcast %cst_56 : f32 to vector<1x64xf32>
    %155 = arith.addf %149, %154 : vector<1x64xf32>
    %156 = math.rsqrt %155 : vector<1x64xf32>
    %157 = vector.broadcast %156 : vector<1x64xf32> to vector<2x64xf32>
    %158 = arith.mulf %153, %157 : vector<2x64xf32>
    %159 = vector.broadcast %133 : vector<1x64xf32> to vector<2x64xf32>
    %160 = arith.addf %158, %159 : vector<2x64xf32>
    %cst_57 = arith.constant 0.000000e+00 : f32
    %161 = vector.broadcast %cst_57 : f32 to vector<2x64xf32>
    %162 = arith.cmpf oge, %160, %161 : vector<2x64xf32>
    %cst_58 = arith.constant 2.000000e-01 : f32
    %163 = vector.broadcast %cst_58 : f32 to vector<2x64xf32>
    %164 = arith.mulf %163, %160 : vector<2x64xf32>
    %165 = arith.select %162, %160, %164 : vector<2x64xi1>, vector<2x64xf32>
    %166 = math.tanh %165 : vector<2x64xf32>
    %c0_59 = arith.constant 0 : index
    %c0_60 = arith.constant 0 : index
    %167 = vector.load %arg11[%c0_59, %c0_60] : memref<2x64xf32, #tpu.memory_space<vmem>>, vector<2x64xf32>
    tpu.vector_store %arg11[%c0_59, %c0_60], %166 {strides = array<i32>} : memref<2x64xf32, #tpu.memory_space<vmem>>, vector<2x64xf32>,
    return
  }
}

</mosaic_0001>

<bundles_post_ra>
// kernel: generator_forward.1
= control target key start
LH: loop header
LB: loop body
LE: loop exit
PB: predicated region body
PF: predicated region fallthrough
CT: control target
= control target key end

     0   :  { %16 = vsyncpa [#allocation3], 0  ;;  %s5682_s0 = inlined_call_operand.vmem [shape: f32[2,16], index: 0, kind: input, shape index: {}]   ;;  %s5683_s1 = inlined_call_operand.vmem [shape: f32[2,4], index: 1, kind: input, shape index: {}]   ;;  %s5684_s2 = inlined_call_operand.vmem [shape: bf16[16,32], index: 2, kind: input, shape index: {}]   ;;  %s5685_s3 = inlined_call_operand.vmem [shape: bf16[4,32], index: 3, kind: input, shape index: {}]   ;;  %s5686_s4 = inlined_call_operand.hbm [shape: bf16[32,512], index: 4, kind: input, shape index: {}]   ;;  %s5687_s5 = inlined_call_operand.vmem [shape: bf16[512,288], index: 5, kind: input, shape index: {}]   ;;  %s5688_s6 = inlined_call_operand.vmem [shape: bf16[288,64], index: 6, kind: input, shape index: {}]   ;;  %s5689_s7 = inlined_call_operand.vmem [shape: f32[3,1152], index: 7, kind: input, shape index: {}]   ;;  %s5690_s8 = inlined_call_operand.vmem [shape: bf16[512,512], index: 8, kind: input, shape index: {}]   ;;  %s5691_s9 = inlined_call_operand.vmem [shape: bf16[288,288], index: 9, kind: input, shape index: {}]   ;;  %s5692_s10 = inlined_call_operand.hbm [shape: bf16[64,64], index: 10, kind: input, shape index: {}]   ;;  %s5693_s11 = inlined_call_operand.vmem [shape: f32[2,64], index: 11, kind: output, shape index: {}]  }
   0x1   :  { %17 = vsyncpa [#allocation5], 0  ;;  %s4448_s17 = smov [#allocation2]   ;;  %s4400_s21 = scalar_lea.hbm %s5686_s4, 1024 }
   0x2   :  { %s31_s18 = sshll.u32 %s4448_s17, 4  ;;  %p4401_p0 = scmp.ne.s32.totalorder %s5686_s4, %s4400_s21  ;;  %s32_s18 = int_to_ptr.vmem [resolvable:$true] %s31_s18 }
   0x3   :  { %p4404_p1 = scmp.lt.u32.totalorder %s4400_s21, %s5686_s4 }
   0x5   :  { %p4406_p2 = pnand %p4404_p1, %p4401_p0 }
   0x7   :  { %4409 = shalt.err (!%p4406_p2)
}
   0x8   :  { %s4410_s26 = scalar_lea.vmem %s32_s18, 1024  ;;  %p4415_p4 = scmp.lt.s32.totalorder %s32_s18, %s32_s18 }
   0x9   :  { %p4411_p3 = scmp.ne.s32.totalorder %s32_s18, %s4410_s26  ;;  %p4416_p5 = scmp.lt.s32.totalorder %s4410_s26, %s4410_s26 }
   0xb   :  { %p4417_p6 = por %p4416_p5, %p4415_p4 }
   0xd   :  { %p4418_p7 = pnand %p4417_p6, %p4411_p3 }
   0xf   :  { %4421 = shalt.err (!%p4418_p7)
}
  0x10   :  { %s4449_s27 = smov 256   ;;  %s4450_s28 = smov 16  }
  0x11   :  { %37 = dma.hbm_to_vmem [thread:$0]  %s5686_s4, 1024, %s32_s18, [#allocation3], %s4449_s27, %s4449_s27, %s4450_s28  }
  0x12   :  { %s4451_s12 = smov [#allocation4]   ;;  %s4422_s16 = scalar_lea.hbm %s5692_s10, 512 }
  0x13   :  { %s53_s13 = sshll.u32 %s4451_s12, 4  ;;  %p4423_p8 = scmp.ne.s32.totalorder %s5692_s10, %s4422_s16  ;;  %s54_s13 = int_to_ptr.vmem [resolvable:$true] %s53_s13 }
  0x14   :  { %p4426_p9 = scmp.lt.u32.totalorder %s4422_s16, %s5692_s10 }
  0x16   :  { %p4428_p10 = pnand %p4426_p9, %p4423_p8 }
  0x18   :  { %4431 = shalt.err (!%p4428_p10)
}
  0x19   :  { %s4432_s22 = scalar_lea.vmem %s54_s13, 512  ;;  %p4437_p12 = scmp.lt.s32.totalorder %s54_s13, %s54_s13 }
  0x1a   :  { %p4433_p11 = scmp.ne.s32.totalorder %s54_s13, %s4432_s22  ;;  %p4438_p13 = scmp.lt.s32.totalorder %s4432_s22, %s4432_s22 }
  0x1c   :  { %p4439_p0 = por %p4438_p13, %p4437_p12 }
  0x1e   :  { %p4440_p1 = pnand %p4439_p0, %p4433_p11 }
  0x20   :  { %4443 = shalt.err (!%p4440_p1)
}
  0x21   :  { %s4452_s4 = smov 64   ;;  %s4453_s18 = smov 4  }
  0x22   :  { %59 = dma.hbm_to_vmem [thread:$0]  %s5692_s10, 512, %s54_s13, [#allocation5], %s4452_s4, %s4452_s4, %s4453_s18  }
  0x23   :  { %4444 = dma.done.wait [#allocation3], 1024  }
  0x24   :  { %4445 = vsyncadd [#allocation3], 4294966272 }
  0x25   :  { %4446 = dma.done.wait [#allocation5], 512  }
  0x26   :  { %4447 = vsyncadd [#allocation5], 4294966784  ;;  %v4454_v0 = vmov 0.0   ;;  %vm4455_vm0 = vmmov 0   ;;  %vm84_vm1 = vcmask 1041408   ;;  %v3953_v3 = vld [vmem:[%s5684_s2] sm:$0xff]   ;;  %v178_v19 = vlaneseq }
  0x27   :  { %3886 = vmatprep.subr.bf16.mxu0 %v4454_v0  ;;  %3892 = vmatprep.subr.bf16.mxu1 %v4454_v0  ;;  %v78_v1 = vld [vmem:[%s5685_s3] sm:$0x3]  ;;  %vm80_vm2 = vcmask 31744   ;;  %vm134_vm3 = vcmask 130048   ;;  %v3956_v8 = vld [vmem:[#allocation2 + $0x4] ss:$16 sps:$4 sm:$0xff]  }
  0x28   :  { %3888 = vmatprep.mubr.msk.bf16.mxu0 %vm4455_vm0, %v4454_v0  ;;  %3894 = vmatprep.mubr.msk.bf16.mxu1 %vm4455_vm0, %v4454_v0  ;;  %v86_v2 = vsel %vm84_vm1, %v78_v1, 0  ;;  %v77_v4 = vld [vmem:[%s5683_s1] sm:$0x3]  ;;  %v3959_v9 = vld [vmem:[#allocation2 + $0xc] ss:$16 sps:$4 sm:$0xff]   ;;  %v4456_v16 = vmov 0  }
  0x29   :  { %v73_v5 = vld [vmem:[%s5682_s0] sm:$0x3]  ;;  %3887 = vmatpush3.bf16.msra.mxu0 %v86_v2  ;;  %v79_v6 = vpack.c.bf16 %v77_v4, %v77_v4  ;;  %3893 = vmatpush3.bf16.msra.mxu1 %v3953_v3  ;;  %v3957_v11 = vld [vmem:[#allocation2 + $0x8] ss:$16 sps:$4 sm:$0xff]   ;;  %v3962_v12 = vld [vmem:[#allocation2 + $0x24] ss:$16 sps:$4 sm:$0xff]  }
  0x2a   :  { %v76_v7 = vpack.c.bf16 %v73_v5, %v73_v5  ;;  %v3954_v10 = vld [vmem:[#allocation2] ss:$16 sps:$4 sm:$0xff]   ;;  %310 = vmatprep.subr.bf16.mxu0 %v3956_v8  ;;  %351 = vmatprep.subr.bf16.mxu1 %v3959_v9  ;;  %v3965_v13 = vld [vmem:[#allocation2 + $0x2c] ss:$16 sps:$4 sm:$0xff]   ;;  %v3963_v15 = vld [vmem:[#allocation2 + $0x28] ss:$16 sps:$4 sm:$0xff]  }
  0x2b   :  { %v3960_v14 = vld [vmem:[#allocation2 + $0x20] ss:$16 sps:$4 sm:$0xff]   ;;  %v3968_v17 = vld [vmem:[%s5690_s8 + $0x4] ss:$16 sps:$4 sm:$0xff]   ;;  %v3971_v18 = vld [vmem:[%s5690_s8 + $0xc] ss:$16 sps:$4 sm:$0xff]  }
  0x2c   :  { %3889 = vmatmul.mubr.msk.bf16.vlgmr.msra.gmra.mrb[0].mxu0 %vm80_vm2, %v79_v6  ;;  %3895 = vmatmul.mubr.msk.bf16.vlgmr.msra.gmra.mrb[0].mxu1 %vm134_vm3, %v76_v7  ;;  %v4568_v20 = vshrl.u32 %v178_v19, 7  ;;  %v67_v22 = vld [vmem:[%s5689_s7] sm:$0x7]  ;;  %vm186_vm5 = vcmask 254976   ;;  %vm306_vm6 = vcmask 261120   ;;  %vm592_vm10 = vcmask 1040384  }
  0x2d   :  { %311 = vmatpush1.bf16.msra.mxu0 %v3954_v10  ;;  %352 = vmatpush1.bf16.msra.mxu1 %v3957_v11  ;;  %v3966_v63 = vld [vmem:[%s5690_s8] ss:$16 sps:$4 sm:$0xff]   ;;  %v3969_v1 = vld [vmem:[%s5690_s8 + $0x8] ss:$16 sps:$4 sm:$0xff]   ;;  %v3974_v3 = vld [vmem:[%s5690_s8 + $0x24] ss:$16 sps:$4 sm:$0xff]  }
  0x2e   :  { %312 = vmatprep.subr.bf16.mxu0 %v3962_v12  ;;  %353 = vmatprep.subr.bf16.mxu1 %v3965_v13  ;;  %v4571_v21 = vsub.s32 0, %v4568_v20  ;;  %v4580_v55 = vsub.s32 1, %v4568_v20  ;;  %v4584_v57 = vsub.s32 2, %v4568_v20  ;;  %v3977_v4 = vld [vmem:[%s5690_s8 + $0x2c] ss:$16 sps:$4 sm:$0xff]   ;;  %vm3340_vm15 = vcmask 517120  }
  0x2f   :  { %342 = vmatprep.mubr.bf16.mxu0 %v4456_v16  ;;  %383 = vmatprep.mubr.bf16.mxu1 %v4456_v16  ;;  %v3972_v5 = vld [vmem:[%s5690_s8 + $0x20] ss:$16 sps:$4 sm:$0xff]   ;;  %v3975_v6 = vld [vmem:[%s5690_s8 + $0x28] ss:$16 sps:$4 sm:$0xff]   ;;  %v3980_v7 = vld [vmem:[%s5690_s8 + $0x44] ss:$16 sps:$4 sm:$0xff]  }
  0x30   :  { %v181_v24 = vrot.slane %v67_v22, %v4571_v21  ;;  %v209_v56 = vrot.slane %v67_v22, %v4580_v55  ;;  %v217_v59 = vrot.slane %v67_v22, %v4584_v57  ;;  %v3983_v8 = vld [vmem:[%s5690_s8 + $0x4c] ss:$16 sps:$4 sm:$0xff]   ;;  %v3978_v9 = vld [vmem:[%s5690_s8 + $0x40] ss:$16 sps:$4 sm:$0xff]   ;;  %v3981_v10 = vld [vmem:[%s5690_s8 + $0x48] ss:$16 sps:$4 sm:$0xff]  }
  0x31   :  { %313 = vmatpush1.bf16.msra.mxu0 %v3960_v14  ;;  %354 = vmatpush1.bf16.msra.mxu1 %v3963_v15  ;;  %v3986_v11 = vld [vmem:[%s5690_s8 + $0x64] ss:$16 sps:$4 sm:$0xff]   ;;  %v3989_v12 = vld [vmem:[%s5690_s8 + $0x6c] ss:$16 sps:$4 sm:$0xff]   ;;  %v3984_v13 = vld [vmem:[%s5690_s8 + $0x60] ss:$16 sps:$4 sm:$0xff]  }
  0x32   :  { %1241 = vmatprep.subr.bf16.mxu0 %v3968_v17  ;;  %1323 = vmatprep.subr.bf16.mxu1 %v3971_v18  ;;  %v3987_v14 = vld [vmem:[%s5690_s8 + $0x68] ss:$16 sps:$4 sm:$0xff]   ;;  %v3992_v15 = vld [vmem:[%s5690_s8 + $0x84] ss:$16 sps:$4 sm:$0xff]   ;;  %v3995_v17 = vld [vmem:[%s5690_s8 + $0x8c] ss:$16 sps:$4 sm:$0xff]  }
  0x33   :  { %v3990_v18 = vld [vmem:[%s5690_s8 + $0x80] ss:$16 sps:$4 sm:$0xff]   ;;  %v3993_v19 = vld [vmem:[%s5690_s8 + $0x88] ss:$16 sps:$4 sm:$0xff]   ;;  %v3998_v22 = vld [vmem:[%s5690_s8 + $0xa4] ss:$16 sps:$4 sm:$0xff]  }
  0xff   :  { %v122_v23 = vpop.f32.mrb[0].mxu0  ;;  %v172_v26 = vpop.f32.mrb[0].mxu1 }
 0x100   :  { %v3890_v25 = vpop.f32.mrb[1].mxu0  ;;  %v173_v27 = vadd.f32 %v172_v26, %v122_v23  ;;  %v3896_v29 = vpop.f32.mrb[1].mxu1  ;;  %v4001_v23 = vld [vmem:[%s5690_s8 + $0xac] ss:$16 sps:$4 sm:$0xff]   ;;  %v4004_v26 = vld [vmem:[%s5690_s8 + $0xc4] ss:$16 sps:$4 sm:$0xff]  }
 0x101   :  { %v125_v28 = vpop.f32.mrb[2].mxu0  ;;  %v175_v31 = vpop.f32.mrb[2].mxu1  ;;  %v3999_v25 = vld [vmem:[%s5690_s8 + $0xa8] ss:$16 sps:$4 sm:$0xff]  }
 0x102   :  { %v3891_v30 = vpop.f32.mrb[3].mxu0  ;;  %v182_v32 = vadd.f32 %v181_v24, %v173_v27  ;;  %v3897_v33 = vpop.f32.mrb[3].mxu1  ;;  %v3996_v24 = vld [vmem:[%s5690_s8 + $0xa0] ss:$16 sps:$4 sm:$0xff]   ;;  %v4007_v27 = vld [vmem:[%s5690_s8 + $0xcc] ss:$16 sps:$4 sm:$0xff]  }
 0x103   :  { %v4002_v28 = vld [vmem:[%s5690_s8 + $0xc0] ss:$16 sps:$4 sm:$0xff]   ;;  %v4005_v29 = vld [vmem:[%s5690_s8 + $0xc8] ss:$16 sps:$4 sm:$0xff]   ;;  %v4010_v30 = vld [vmem:[%s5690_s8 + $0xe4] ss:$16 sps:$4 sm:$0xff]  }
 0x104   :  { %vm183_vm4 = vcmp.ge.f32.partialorder %v182_v32, 0.0  ;;  %v184_v34 = vmul.f32 0.2, %v182_v32  ;;  %v4013_v31 = vld [vmem:[%s5690_s8 + $0xec] ss:$16 sps:$4 sm:$0xff]  }
 0x105   :  { %v4011_v33 = vld [vmem:[%s5690_s8 + $0xe8] ss:$16 sps:$4 sm:$0xff]  }
 0x106   :  { %v185_v35 = vsel %vm183_vm4, %v182_v32, %v184_v34  ;;  %v4008_v32 = vld [vmem:[%s5690_s8 + $0xe0] ss:$16 sps:$4 sm:$0xff]   ;;  %v4016_v34 = vld [vmem:[%s5690_s8 + $0x104] ss:$16 sps:$4 sm:$0xff]  }
 0x107   :  { %v187_v36 = vsel %vm186_vm5, %v185_v35, 0.0 }
 0x108   :  { %v188_v37 = vrot.slane %v187_v36, 4 }
 0x10a   :  { %v189_v38 = vadd.f32 %v188_v37, %v187_v36  ;;  %v4014_v36 = vld [vmem:[%s5690_s8 + $0x100] ss:$16 sps:$4 sm:$0xff]   ;;  %v4017_v37 = vld [vmem:[%s5690_s8 + $0x108] ss:$16 sps:$4 sm:$0xff]  }
 0x10c   :  { %v190_v39 = vrot.slane %v189_v38, 2 }
 0x10e   :  { %v191_v40 = vadd.f32 %v190_v39, %v189_v38  ;;  %v4022_v38 = vld [vmem:[%s5690_s8 + $0x124] ss:$16 sps:$4 sm:$0xff]   ;;  %v4025_v39 = vld [vmem:[%s5690_s8 + $0x12c] ss:$16 sps:$4 sm:$0xff]  }
 0x110   :  { %v192_v41 = vrot.slane %v191_v40, 1 }
 0x112   :  { %v193_v42 = vadd.f32 %v192_v41, %v191_v40  ;;  %v4020_v40 = vld [vmem:[%s5690_s8 + $0x120] ss:$16 sps:$4 sm:$0xff]   ;;  %v4023_v41 = vld [vmem:[%s5690_s8 + $0x128] ss:$16 sps:$4 sm:$0xff]  }
 0x114   :  { %v195_v43 = vmul.f32 0.5, %v193_v42  ;;  %v4028_v42 = vld [vmem:[%s5690_s8 + $0x144] ss:$16 sps:$4 sm:$0xff]  }
 0x116   :  { %v196_v44 = vsub.f32 %v185_v35, %v195_v43  ;;  %v4019_v35 = vld [vmem:[%s5690_s8 + $0x10c] ss:$16 sps:$4 sm:$0xff]  }
 0x117   :  { %v4031_v43 = vld [vmem:[%s5690_s8 + $0x14c] ss:$16 sps:$4 sm:$0xff]  }
 0x118   :  { %v197_v45 = vmul.f32 %v196_v44, %v196_v44  ;;  %v210_v58 = vmul.f32 %v209_v56, %v196_v44  ;;  %v4026_v44 = vld [vmem:[%s5690_s8 + $0x140] ss:$16 sps:$4 sm:$0xff]   ;;  %v4049_v56 = vld [vmem:[%s5690_s8 + $0x1ac] ss:$16 sps:$4 sm:$0xff]  }
 0x11a   :  { %v198_v46 = vsel %vm186_vm5, %v197_v45, 0.0  ;;  %v4029_v45 = vld [vmem:[%s5690_s8 + $0x148] ss:$16 sps:$4 sm:$0xff]  }
 0x11b   :  { %v199_v47 = vrot.slane %v198_v46, 4 }
 0x11d   :  { %v200_v48 = vadd.f32 %v199_v47, %v198_v46  ;;  %v4034_v46 = vld [vmem:[%s5690_s8 + $0x164] ss:$16 sps:$4 sm:$0xff]   ;;  %v4037_v47 = vld [vmem:[%s5690_s8 + $0x16c] ss:$16 sps:$4 sm:$0xff]  }
 0x11f   :  { %v201_v49 = vrot.slane %v200_v48, 2 }
 0x121   :  { %v202_v50 = vadd.f32 %v201_v49, %v200_v48  ;;  %v4032_v48 = vld [vmem:[%s5690_s8 + $0x160] ss:$16 sps:$4 sm:$0xff]   ;;  %v4035_v49 = vld [vmem:[%s5690_s8 + $0x168] ss:$16 sps:$4 sm:$0xff]  }
 0x123   :  { %v203_v51 = vrot.slane %v202_v50, 1 }
 0x125   :  { %v204_v52 = vadd.f32 %v203_v51, %v202_v50  ;;  %v4040_v50 = vld [vmem:[%s5690_s8 + $0x184] ss:$16 sps:$4 sm:$0xff]   ;;  %v4043_v51 = vld [vmem:[%s5690_s8 + $0x18c] ss:$16 sps:$4 sm:$0xff]  }
 0x127   :  { %v205_v53 = vmul.f32 0.5, %v204_v52  ;;  %v4038_v52 = vld [vmem:[%s5690_s8 + $0x180] ss:$16 sps:$4 sm:$0xff]  }
 0x129   :  { %v211_v54 = vadd.f32 1e-05, %v205_v53  ;;  %v4041_v53 = vld [vmem:[%s5690_s8 + $0x188] ss:$16 sps:$4 sm:$0xff]  }
 0x12b   :  { %4380 = vrsqrt.f32 %v211_v54  ;;  %v4046_v54 = vld [vmem:[%s5690_s8 + $0x1a4] ss:$16 sps:$4 sm:$0xff]  }
 0x135   :  { %v4381_v60 = vpop.eup %4380 }
 0x136   :  { %v213_v61 = vmul.f32 %v4381_v60, %v210_v58  ;;  %v4044_v58 = vld [vmem:[%s5690_s8 + $0x1a0] ss:$16 sps:$4 sm:$0xff]  }
 0x137   :  { %v4050_v60 = vld [vmem:[%s5690_s8 + $0x1c0] ss:$16 sps:$4 sm:$0xff]  }
 0x138   :  { %v218_v62 = vadd.f32 %v217_v59, %v213_v61  ;;  %v4047_v59 = vld [vmem:[%s5690_s8 + $0x1a8] ss:$16 sps:$4 sm:$0xff]   ;;  %v4052_v61 = vld [vmem:[%s5690_s8 + $0x1c4] ss:$16 sps:$4 sm:$0xff]  }
 0x13a   :  { %v227_v2 = vpack.c.bf16 %v218_v62, %v218_v62  ;;  %v4053_v62 = vld [vmem:[%s5690_s8 + $0x1c8] ss:$16 sps:$4 sm:$0xff]  }
 0x13c   :  { %3477 = vmatmul.mubr.msk.bf16.vlgmr.msra.gmra.mrb[4].mxu0 %vm306_vm6, %v227_v2  ;;  %3478 = vmatmul.mubr.msk.bf16.vlgmr.msra.gmra.mrb[4].mxu1 %vm306_vm6, %v227_v2  ;;  %v4061_v2 = vld [vmem:[%s5690_s8 + $0x1ec] ss:$16 sps:$4 sm:$0xff]  }
 0x13d   :  { %1242 = vmatpush1.bf16.msra.mxu0 %v3966_v63  ;;  %1324 = vmatpush1.bf16.msra.mxu1 %v3969_v1  ;;  %v4055_v63 = vld [vmem:[%s5690_s8 + $0x1cc] ss:$16 sps:$4 sm:$0xff]   ;;  %v4058_v1 = vld [vmem:[%s5690_s8 + $0x1e4] ss:$16 sps:$4 sm:$0xff]  }
 0x13e   :  { %1243 = vmatprep.subr.bf16.mxu0 %v3974_v3  ;;  %1325 = vmatprep.subr.bf16.mxu1 %v3977_v4  ;;  %v4056_v3 = vld [vmem:[%s5690_s8 + $0x1e0] ss:$16 sps:$4 sm:$0xff]   ;;  %v4059_v4 = vld [vmem:[%s5690_s8 + $0x1e8] ss:$16 sps:$4 sm:$0xff]  }
 0x141   :  { %1244 = vmatpush1.bf16.msra.mxu0 %v3972_v5  ;;  %1326 = vmatpush1.bf16.msra.mxu1 %v3975_v6  ;;  %v4064_v5 = vld [vmem:[%s5690_s8 + $0x204] ss:$16 sps:$4 sm:$0xff]   ;;  %v4067_v6 = vld [vmem:[%s5690_s8 + $0x20c] ss:$16 sps:$4 sm:$0xff]  }
 0x142   :  { %1245 = vmatprep.subr.bf16.mxu0 %v3980_v7  ;;  %1327 = vmatprep.subr.bf16.mxu1 %v3983_v8  ;;  %v4784_v7 = vld [vmem:[%s5689_s7 + $0x4] sm:$0x77]  ;;  %v4787_v8 = vsub.s32 4, %v4568_v20 }
 0x145   :  { %1246 = vmatpush1.bf16.msra.mxu0 %v3978_v9  ;;  %1328 = vmatpush1.bf16.msra.mxu1 %v3981_v10  ;;  %v4792_v9 = vld [vmem:[%s5689_s7 + $0xc] sm:$0x77]  ;;  %v233_v10 = vrot.slane %v4784_v7, %v4571_v21 }
 0x146   :  { %1247 = vmatprep.subr.bf16.mxu0 %v3986_v11  ;;  %1329 = vmatprep.subr.bf16.mxu1 %v3989_v12  ;;  %v237_v11 = vrot.slane %v4784_v7, %v4787_v8  ;;  %v245_v12 = vrot.slane %v4792_v9, %v4787_v8 }
 0x149   :  { %1248 = vmatpush1.bf16.msra.mxu0 %v3984_v13  ;;  %1330 = vmatpush1.bf16.msra.mxu1 %v3987_v14  ;;  %v253_v13 = vrot.slane %v233_v10, %v4571_v21  ;;  %v257_v14 = vrot.slane %v237_v11, %v4571_v21 }
 0x14a   :  { %1249 = vmatprep.subr.bf16.mxu0 %v3992_v15  ;;  %1331 = vmatprep.subr.bf16.mxu1 %v3995_v17  ;;  %v265_v15 = vrot.slane %v245_v12, %v4571_v21 }
 0x14d   :  { %1250 = vmatpush1.bf16.msra.mxu0 %v3990_v18  ;;  %1332 = vmatpush1.bf16.msra.mxu1 %v3993_v19 }
 0x14e   :  { %1251 = vmatprep.subr.bf16.mxu0 %v3998_v22  ;;  %1333 = vmatprep.subr.bf16.mxu1 %v4001_v23 }
 0x151   :  { %1252 = vmatpush1.bf16.msra.mxu0 %v3996_v24  ;;  %1334 = vmatpush1.bf16.msra.mxu1 %v3999_v25 }
 0x152   :  { %1253 = vmatprep.subr.bf16.mxu0 %v4004_v26  ;;  %1335 = vmatprep.subr.bf16.mxu1 %v4007_v27 }
 0x155   :  { %1254 = vmatpush1.bf16.msra.mxu0 %v4002_v28  ;;  %1336 = vmatpush1.bf16.msra.mxu1 %v4005_v29 }
 0x156   :  { %1255 = vmatprep.subr.bf16.mxu0 %v4010_v30  ;;  %1337 = vmatprep.subr.bf16.mxu1 %v4013_v31 }
 0x159   :  { %1256 = vmatpush1.bf16.msra.mxu0 %v4008_v32  ;;  %1338 = vmatpush1.bf16.msra.mxu1 %v4011_v33 }
 0x15a   :  { %1257 = vmatprep.subr.bf16.mxu0 %v4016_v34  ;;  %1339 = vmatprep.subr.bf16.mxu1 %v4019_v35 }
 0x15d   :  { %1258 = vmatpush1.bf16.msra.mxu0 %v4014_v36  ;;  %1340 = vmatpush1.bf16.msra.mxu1 %v4017_v37 }
 0x15e   :  { %1259 = vmatprep.subr.bf16.mxu0 %v4022_v38  ;;  %1341 = vmatprep.subr.bf16.mxu1 %v4025_v39 }
 0x161   :  { %1260 = vmatpush1.bf16.msra.mxu0 %v4020_v40  ;;  %1342 = vmatpush1.bf16.msra.mxu1 %v4023_v41 }
 0x162   :  { %1261 = vmatprep.subr.bf16.mxu0 %v4028_v42  ;;  %1343 = vmatprep.subr.bf16.mxu1 %v4031_v43 }
 0x165   :  { %1262 = vmatpush1.bf16.msra.mxu0 %v4026_v44  ;;  %1344 = vmatpush1.bf16.msra.mxu1 %v4029_v45 }
 0x166   :  { %1263 = vmatprep.subr.bf16.mxu0 %v4034_v46  ;;  %1345 = vmatprep.subr.bf16.mxu1 %v4037_v47 }
 0x169   :  { %1264 = vmatpush1.bf16.msra.mxu0 %v4032_v48  ;;  %1346 = vmatpush1.bf16.msra.mxu1 %v4035_v49 }
 0x16a   :  { %1265 = vmatprep.subr.bf16.mxu0 %v4040_v50  ;;  %1347 = vmatprep.subr.bf16.mxu1 %v4043_v51 }
 0x16d   :  { %1266 = vmatpush1.bf16.msra.mxu0 %v4038_v52  ;;  %1348 = vmatpush1.bf16.msra.mxu1 %v4041_v53 }
 0x16e   :  { %1267 = vmatprep.subr.bf16.mxu0 %v4046_v54  ;;  %1349 = vmatprep.subr.bf16.mxu1 %v4049_v56 }
 0x171   :  { %1268 = vmatpush1.bf16.msra.mxu0 %v4044_v58  ;;  %1350 = vmatpush1.bf16.msra.mxu1 %v4047_v59 }
 0x172   :  { %1269 = vmatprep.subr.bf16.mxu0 %v4052_v61  ;;  %1351 = vmatprep.subr.bf16.mxu1 %v4055_v63 }
 0x175   :  { %1270 = vmatpush1.bf16.msra.mxu0 %v4050_v60  ;;  %1352 = vmatpush1.bf16.msra.mxu1 %v4053_v62 }
 0x176   :  { %1271 = vmatprep.subr.bf16.mxu0 %v4058_v1  ;;  %1353 = vmatprep.subr.bf16.mxu1 %v4061_v2 }
 0x179   :  { %1272 = vmatpush1.bf16.msra.mxu0 %v4056_v3  ;;  %1354 = vmatpush1.bf16.msra.mxu1 %v4059_v4 }
 0x17a   :  { %1282 = vmatprep.subr.bf16.mxu0 %v4064_v5  ;;  %1364 = vmatprep.subr.bf16.mxu1 %v4067_v6 }
 0x20f   :  { %v344_v17 = vpop.f32.mrb[4].mxu0  ;;  %v4803_v18 = vpop.f32.mrb[4].mxu1 }
 0x210   :  { %v345_v19 = vadd.f32 %v344_v17, %v253_v13  ;;  %v346_v22 = vpop.f32.mrb[5].mxu0  ;;  %v387_v23 = vpop.f32.mrb[5].mxu1 }
 0x211   :  { %v347_v24 = vadd.f32 %v346_v22, %v257_v14  ;;  %v388_v25 = vadd.f32 %v387_v23, %v265_v15  ;;  %v348_v26 = vpop.f32.mrb[6].mxu0  ;;  %v389_v27 = vpop.f32.mrb[6].mxu1 }
 0x212   :  { %vm392_vm7 = vcmp.ge.f32.partialorder %v345_v19, 0.0  ;;  %v396_v28 = vmul.f32 0.2, %v345_v19  ;;  %v349_v32 = vpop.f32.mrb[7].mxu0  ;;  %v390_v33 = vpop.f32.mrb[7].mxu1 }
 0x213   :  { %vm393_vm8 = vcmp.ge.f32.partialorder %v347_v24, 0.0  ;;  %v397_v29 = vmul.f32 0.2, %v347_v24  ;;  %vm395_vm9 = vcmp.ge.f32.partialorder %v388_v25, 0.0  ;;  %v399_v30 = vmul.f32 0.2, %v388_v25 }
 0x214   :  { %v4805_v31 = vsel %vm392_vm7, %v345_v19, %v396_v28  ;;  %v4065_v32 = vld [vmem:[%s5690_s8 + $0x208] ss:$16 sps:$4 sm:$0xff]  }
 0x215   :  { %v532_v34 = vsel %vm84_vm1, %v4805_v31, 0.0  ;;  %v560_v35 = vmul.f32 %v4805_v31, %v4805_v31  ;;  %v4811_v37 = vsel %vm393_vm8, %v347_v24, %v397_v29  ;;  %v4813_v38 = vsel %vm395_vm9, %v388_v25, %v399_v30  ;;  %v4062_v30 = vld [vmem:[%s5690_s8 + $0x200] ss:$16 sps:$4 sm:$0xff]  }
 0x216   :  { %v533_v36 = vrot.slane %v532_v34, 4  ;;  %v539_v40 = vsel %vm84_vm1, %v4811_v37, 0.0  ;;  %v561_v41 = vmul.f32 %v4811_v37, %v4811_v37  ;;  %v553_v46 = vsel %vm84_vm1, %v4813_v38, 0.0 }
 0x217   :  { %v564_v39 = vsel %vm84_vm1, %v560_v35, 0.0  ;;  %v540_v44 = vrot.slane %v539_v40, 4  ;;  %v563_v47 = vmul.f32 %v4813_v38, %v4813_v38  ;;  %v554_v52 = vrot.slane %v553_v46, 4  ;;  %v4070_v35 = vld [vmem:[%s5690_s8 + $0x224] ss:$16 sps:$4 sm:$0xff]  }
 0x218   :  { %v534_v42 = vadd.f32 %v533_v36, %v532_v34  ;;  %v565_v43 = vrot.slane %v564_v39, 4  ;;  %v571_v45 = vsel %vm84_vm1, %v561_v41, 0.0  ;;  %v4073_v36 = vld [vmem:[%s5690_s8 + $0x22c] ss:$16 sps:$4 sm:$0xff]   ;;  %v4071_v41 = vld [vmem:[%s5690_s8 + $0x228] ss:$16 sps:$4 sm:$0xff]  }
 0x219   :  { %v541_v50 = vadd.f32 %v540_v44, %v539_v40  ;;  %v572_v51 = vrot.slane %v571_v45, 4  ;;  %v585_v53 = vsel %vm84_vm1, %v563_v47, 0.0  ;;  %v555_v60 = vadd.f32 %v554_v52, %v553_v46  ;;  %v4068_v40 = vld [vmem:[%s5690_s8 + $0x220] ss:$16 sps:$4 sm:$0xff]   ;;  %v4082_v46 = vld [vmem:[%s5690_s8 + $0x264] ss:$16 sps:$4 sm:$0xff]  }
 0x21a   :  { %v535_v48 = vrot.slane %v534_v42, 2  ;;  %v566_v49 = vadd.f32 %v565_v43, %v564_v39  ;;  %v586_v61 = vrot.slane %v585_v53, 4  ;;  %v4079_v43 = vld [vmem:[%s5690_s8 + $0x24c] ss:$16 sps:$4 sm:$0xff]   ;;  %v4074_v44 = vld [vmem:[%s5690_s8 + $0x240] ss:$16 sps:$4 sm:$0xff]  }
 0x21b   :  { %v542_v58 = vrot.slane %v541_v50, 2  ;;  %v573_v59 = vadd.f32 %v572_v51, %v571_v45  ;;  %v556_v2 = vrot.slane %v555_v60, 2  ;;  %v4077_v45 = vld [vmem:[%s5690_s8 + $0x248] ss:$16 sps:$4 sm:$0xff]   ;;  %v4085_v47 = vld [vmem:[%s5690_s8 + $0x26c] ss:$16 sps:$4 sm:$0xff]  }
 0x21c   :  { %v536_v54 = vadd.f32 %v535_v48, %v534_v42  ;;  %v567_v56 = vrot.slane %v566_v49, 2  ;;  %v587_v3 = vadd.f32 %v586_v61, %v585_v53  ;;  %v4076_v42 = vld [vmem:[%s5690_s8 + $0x244] ss:$16 sps:$4 sm:$0xff]   ;;  %v241_v48 = vrot.slane %v4792_v9, %v4571_v21  ;;  %v4091_v52 = vld [vmem:[%s5690_s8 + $0x28c] ss:$16 sps:$4 sm:$0xff]  }
 0x21d   :  { %v543_v63 = vadd.f32 %v542_v58, %v541_v50  ;;  %v574_v1 = vrot.slane %v573_v59, 2  ;;  %v557_v6 = vadd.f32 %v556_v2, %v555_v60  ;;  %v4083_v50 = vld [vmem:[%s5690_s8 + $0x268] ss:$16 sps:$4 sm:$0xff]   ;;  %v4088_v51 = vld [vmem:[%s5690_s8 + $0x284] ss:$16 sps:$4 sm:$0xff]  }
 0x21e   :  { %v568_v62 = vadd.f32 %v567_v56, %v566_v49  ;;  %v537_v4 = vrot.slane %v536_v54, 1  ;;  %v588_v10 = vrot.slane %v587_v3, 2  ;;  %v4080_v49 = vld [vmem:[%s5690_s8 + $0x260] ss:$16 sps:$4 sm:$0xff]   ;;  %v261_v53 = vrot.slane %v241_v48, %v4571_v21  ;;  %v4089_v56 = vld [vmem:[%s5690_s8 + $0x288] ss:$16 sps:$4 sm:$0xff]  }
 0x21f   :  { %v544_v11 = vrot.slane %v543_v63, 1  ;;  %v575_v12 = vadd.f32 %v574_v1, %v573_v59  ;;  %v558_v15 = vrot.slane %v557_v6, 1  ;;  %v4094_v58 = vld [vmem:[%s5690_s8 + $0x2a4] ss:$16 sps:$4 sm:$0xff]   ;;  %v4097_v59 = vld [vmem:[%s5690_s8 + $0x2ac] ss:$16 sps:$4 sm:$0xff]  }
 0x220   :  { %v569_v5 = vrot.slane %v568_v62, 1  ;;  %v589_v17 = vadd.f32 %v588_v10, %v587_v3  ;;  %v538_v19 = vadd.f32 %v537_v4, %v536_v54  ;;  %v4086_v54 = vld [vmem:[%s5690_s8 + $0x280] ss:$16 sps:$4 sm:$0xff]   ;;  %v386_v60 = vadd.f32 %v4803_v18, %v261_v53  ;;  %v4103_v18 = vld [vmem:[%s5690_s8 + $0x2cc] ss:$16 sps:$4 sm:$0xff]  }
 0x221   :  { %v576_v14 = vrot.slane %v575_v12, 1  ;;  %v545_v22 = vadd.f32 %v544_v11, %v543_v63  ;;  %v559_v27 = vadd.f32 %v558_v15, %v557_v6  ;;  %v4092_v61 = vld [vmem:[%s5690_s8 + $0x2a0] ss:$16 sps:$4 sm:$0xff]   ;;  %v4100_v63 = vld [vmem:[%s5690_s8 + $0x2c4] ss:$16 sps:$4 sm:$0xff]  }
 0x222   :  { %v570_v13 = vadd.f32 %v569_v5, %v568_v62  ;;  %v590_v24 = vrot.slane %v589_v17, 1  ;;  %v4095_v62 = vld [vmem:[%s5690_s8 + $0x2a8] ss:$16 sps:$4 sm:$0xff]   ;;  %v398_v1 = vmul.f32 0.2, %v386_v60  ;;  %vm394_vm11 = vcmp.ge.f32.partialorder %v386_v60, 0.0 }
 0x223   :  { %v577_v23 = vadd.f32 %v576_v14, %v575_v12  ;;  %v4098_v2 = vld [vmem:[%s5690_s8 + $0x2c0] ss:$16 sps:$4 sm:$0xff]   ;;  %v4101_v3 = vld [vmem:[%s5690_s8 + $0x2c8] ss:$16 sps:$4 sm:$0xff]   ;;  %v4106_v4 = vld [vmem:[%s5690_s8 + $0x2e4] ss:$16 sps:$4 sm:$0xff]  }
 0x224   :  { %v593_v25 = vsel %vm592_vm10, %v538_v19, %v570_v13  ;;  %v591_v28 = vadd.f32 %v590_v24, %v589_v17  ;;  %v4109_v5 = vld [vmem:[%s5690_s8 + $0x2ec] ss:$16 sps:$4 sm:$0xff]   ;;  %v4917_v6 = vsel %vm394_vm11, %v386_v60, %v398_v1  ;;  %v4104_v10 = vld [vmem:[%s5690_s8 + $0x2e0] ss:$16 sps:$4 sm:$0xff]   ;;  %v4107_v11 = vld [vmem:[%s5690_s8 + $0x2e8] ss:$16 sps:$4 sm:$0xff]  }
 0x225   :  { %v594_v26 = vsel %vm592_vm10, %v545_v22, %v577_v23  ;;  %v597_v33 = vpack.c.bf16 %v593_v25, %v593_v25  ;;  %v4112_v12 = vld [vmem:[%s5690_s8 + $0x304] ss:$16 sps:$4 sm:$0xff]   ;;  %v4115_v13 = vld [vmem:[%s5690_s8 + $0x30c] ss:$16 sps:$4 sm:$0xff]   ;;  %v562_v14 = vmul.f32 %v4917_v6, %v4917_v6  ;;  %v4110_v15 = vld [vmem:[%s5690_s8 + $0x300] ss:$16 sps:$4 sm:$0xff]  }
 0x226   :  { %v598_v29 = vpack.c.bf16 %v594_v26, %v594_v26  ;;  %v596_v34 = vsel %vm592_vm10, %v559_v27, %v591_v28  ;;  %v4113_v17 = vld [vmem:[%s5690_s8 + $0x308] ss:$16 sps:$4 sm:$0xff]   ;;  %v4118_v19 = vld [vmem:[%s5690_s8 + $0x324] ss:$16 sps:$4 sm:$0xff]   ;;  %v4121_v22 = vld [vmem:[%s5690_s8 + $0x32c] ss:$16 sps:$4 sm:$0xff]  }
 0x227   :  { %v600_v39 = vpack.c.bf16 %v596_v34, %v596_v34  ;;  %v578_v23 = vsel %vm84_vm1, %v562_v14, 0.0  ;;  %v4116_v24 = vld [vmem:[%s5690_s8 + $0x320] ss:$16 sps:$4 sm:$0xff]   ;;  %v4119_v25 = vld [vmem:[%s5690_s8 + $0x328] ss:$16 sps:$4 sm:$0xff]   ;;  %v546_v26 = vsel %vm84_vm1, %v4917_v6, 0.0 }
 0x228   :  { %1273 = vmatprep.mubr.bf16.mxu0 %v598_v29  ;;  %1355 = vmatprep.mubr.bf16.mxu1 %v598_v29  ;;  %v4124_v27 = vld [vmem:[%s5690_s8 + $0x344] ss:$16 sps:$4 sm:$0xff]   ;;  %v4127_v28 = vld [vmem:[%s5690_s8 + $0x34c] ss:$16 sps:$4 sm:$0xff]   ;;  %v579_v29 = vrot.slane %v578_v23, 4 }
 0x229   :  { %1274 = vmatmul.mubr.bf16.vlgmr.msra.gmra.mrb[8].mxu0 %v597_v33  ;;  %1356 = vmatmul.mubr.bf16.vlgmr.msra.gmra.mrb[8].mxu1 %v597_v33  ;;  %v4125_v33 = vld [vmem:[%s5690_s8 + $0x348] ss:$16 sps:$4 sm:$0xff]   ;;  %v4130_v34 = vld [vmem:[%s5690_s8 + $0x364] ss:$16 sps:$4 sm:$0xff]   ;;  %v4146_v60 = vld [vmem:[%s5690_s8 + $0x3c0] ss:$16 sps:$4 sm:$0xff]  }
 0x22a   :  { %1283 = vmatpush1.bf16.msra.mxu0 %v4062_v30  ;;  %1365 = vmatpush1.bf16.msra.mxu1 %v4065_v32  ;;  %v547_v30 = vrot.slane %v546_v26, 4  ;;  %v4122_v32 = vld [vmem:[%s5690_s8 + $0x340] ss:$16 sps:$4 sm:$0xff]   ;;  %v4142_v48 = vld [vmem:[%s5690_s8 + $0x3a4] ss:$16 sps:$4 sm:$0xff]  }
 0x22b   :  { %1314 = vmatprep.mubr.bf16.mxu0 %v600_v39  ;;  %1396 = vmatprep.mubr.bf16.mxu1 %v600_v39  ;;  %v4143_v53 = vld [vmem:[%s5690_s8 + $0x3a8] ss:$16 sps:$4 sm:$0xff]   ;;  %v4152_v1 = vld [vmem:[%s5690_s8 + $0x3e0] ss:$16 sps:$4 sm:$0xff]  }
 0x22c   :  { %1284 = vmatprep.subr.bf16.mxu0 %v4070_v35  ;;  %1366 = vmatprep.subr.bf16.mxu1 %v4073_v36  ;;  %v4133_v35 = vld [vmem:[%s5690_s8 + $0x36c] ss:$16 sps:$4 sm:$0xff]   ;;  %v580_v36 = vadd.f32 %v579_v29, %v578_v23  ;;  %v548_v39 = vadd.f32 %v547_v30, %v546_v26  ;;  %v4166_v14 = vld [vmem:[%s5687_s5 + $0x34] ss:$12 sps:$4 sm:$0xff]   ;;  %v4184_v30 = vld [vmem:[%s5687_s5 + $0xc4] ss:$12 sps:$4 sm:$0xff]  }
 0x22d   :  { %v4170_v23 = vld [vmem:[%s5687_s5 + $0x60] ss:$12 sps:$4 sm:$0xff]   ;;  %v4179_v29 = vld [vmem:[%s5687_s5 + $0xa8] ss:$12 sps:$4 sm:$0xff]  }
 0x22e   :  { %1285 = vmatpush1.bf16.msra.mxu0 %v4068_v40  ;;  %1367 = vmatpush1.bf16.msra.mxu1 %v4071_v41  ;;  %v4128_v40 = vld [vmem:[%s5690_s8 + $0x360] ss:$16 sps:$4 sm:$0xff]   ;;  %v4131_v41 = vld [vmem:[%s5690_s8 + $0x368] ss:$16 sps:$4 sm:$0xff]  }
 0x22f   :  { %1286 = vmatprep.subr.bf16.mxu0 %v4076_v42  ;;  %1368 = vmatprep.subr.bf16.mxu1 %v4079_v43  ;;  %v4136_v42 = vld [vmem:[%s5690_s8 + $0x384] ss:$16 sps:$4 sm:$0xff]   ;;  %v4139_v43 = vld [vmem:[%s5690_s8 + $0x38c] ss:$16 sps:$4 sm:$0xff]  }
 0x230   :  { %v4178_v26 = vld [vmem:[%s5687_s5 + $0x94] ss:$12 sps:$4 sm:$0xff]  }
 0x232   :  { %1287 = vmatpush1.bf16.msra.mxu0 %v4074_v44  ;;  %1369 = vmatpush1.bf16.msra.mxu1 %v4077_v45  ;;  %v581_v44 = vrot.slane %v580_v36, 2  ;;  %v549_v45 = vrot.slane %v548_v39, 2 }
 0x233   :  { %1288 = vmatprep.subr.bf16.mxu0 %v4082_v46  ;;  %1370 = vmatprep.subr.bf16.mxu1 %v4085_v47  ;;  %v4134_v46 = vld [vmem:[%s5690_s8 + $0x380] ss:$16 sps:$4 sm:$0xff]   ;;  %v4137_v47 = vld [vmem:[%s5690_s8 + $0x388] ss:$16 sps:$4 sm:$0xff]  }
 0x236   :  { %1289 = vmatpush1.bf16.msra.mxu0 %v4080_v49  ;;  %1371 = vmatpush1.bf16.msra.mxu1 %v4083_v50  ;;  %v4145_v49 = vld [vmem:[%s5690_s8 + $0x3ac] ss:$16 sps:$4 sm:$0xff]   ;;  %v582_v50 = vadd.f32 %v581_v44, %v580_v36  ;;  %v4196_v44 = vld [vmem:[%s5687_s5 + $0x38] ss:$12 sps:$4 sm:$0xff]  }
 0x237   :  { %1290 = vmatprep.subr.bf16.mxu0 %v4088_v51  ;;  %1372 = vmatprep.subr.bf16.mxu1 %v4091_v52  ;;  %v550_v51 = vadd.f32 %v549_v45, %v548_v39  ;;  %v4140_v52 = vld [vmem:[%s5690_s8 + $0x3a0] ss:$16 sps:$4 sm:$0xff]   ;;  %v4187_v39 = vld [vmem:[%s5687_s5 + $0xd8] ss:$12 sps:$4 sm:$0xff]  }
 0x238   :  { %v4190_v36 = vld [vmem:[%s5687_s5 + $0xe0] ss:$12 sps:$4 sm:$0xff]  }
 0x239   :  { %v4199_v45 = vld [vmem:[%s5687_s5 + $0x10c] ss:$12 sps:$4 sm:$0xff]  }
 0x23a   :  { %1291 = vmatpush1.bf16.msra.mxu0 %v4086_v54  ;;  %1373 = vmatpush1.bf16.msra.mxu1 %v4089_v56  ;;  %v4148_v54 = vld [vmem:[%s5690_s8 + $0x3c4] ss:$16 sps:$4 sm:$0xff]   ;;  %v4151_v56 = vld [vmem:[%s5690_s8 + $0x3cc] ss:$16 sps:$4 sm:$0xff]  }
 0x23b   :  { %1292 = vmatprep.subr.bf16.mxu0 %v4094_v58  ;;  %1374 = vmatprep.subr.bf16.mxu1 %v4097_v59  ;;  %v583_v58 = vrot.slane %v582_v50, 1  ;;  %v551_v59 = vrot.slane %v550_v51, 1 }
 0x23e   :  { %1293 = vmatpush1.bf16.msra.mxu0 %v4092_v61  ;;  %1375 = vmatpush1.bf16.msra.mxu1 %v4095_v62  ;;  %v4149_v61 = vld [vmem:[%s5690_s8 + $0x3c8] ss:$16 sps:$4 sm:$0xff]   ;;  %v4154_v62 = vld [vmem:[%s5690_s8 + $0x3e4] ss:$16 sps:$4 sm:$0xff]  }
 0x23f   :  { %1294 = vmatprep.subr.bf16.mxu0 %v4100_v63  ;;  %1376 = vmatprep.subr.bf16.mxu1 %v4103_v18  ;;  %v4157_v63 = vld [vmem:[%s5690_s8 + $0x3ec] ss:$16 sps:$4 sm:$0xff]   ;;  %v584_v18 = vadd.f32 %v583_v58, %v582_v50  ;;  %v4204_v50 = vld [vmem:[%s5687_s5 + $0x124] ss:$12 sps:$4 sm:$0xff]  }
 0x240   :  { %v4211_v58 = vld [vmem:[%s5687_s5 + $0x80] ss:$12 sps:$4 sm:$0xff]  }
 0x242   :  { %1295 = vmatpush1.bf16.msra.mxu0 %v4098_v2  ;;  %1377 = vmatpush1.bf16.msra.mxu1 %v4101_v3  ;;  %v4155_v2 = vld [vmem:[%s5690_s8 + $0x3e8] ss:$16 sps:$4 sm:$0xff]   ;;  %v552_v3 = vadd.f32 %v551_v59, %v550_v51  ;;  %v4214_v59 = vld [vmem:[%s5687_s5 + $0x154] ss:$12 sps:$4 sm:$0xff]  }
 0x243   :  { %1296 = vmatprep.subr.bf16.mxu0 %v4106_v4  ;;  %1378 = vmatprep.subr.bf16.mxu1 %v4109_v5  ;;  %v4160_v4 = vld [vmem:[%s5687_s5 + $0x4] ss:$12 sps:$4 sm:$0xff]   ;;  %v4205_v51 = vld [vmem:[%s5687_s5 + $0x128] ss:$12 sps:$4 sm:$0xff]  }
 0x244   :  { %v595_v5 = vsel %vm592_vm10, %v552_v3, %v584_v18  ;;  %v4220_v18 = vld [vmem:[%s5687_s5 + $0x170] ss:$12 sps:$4 sm:$0xff]  }
 0x245   :  { %v4224_v3 = vld [vmem:[%s5687_s5 + $0x184] ss:$12 sps:$4 sm:$0xff]  }
 0x246   :  { %1297 = vmatpush1.bf16.msra.mxu0 %v4104_v10  ;;  %1379 = vmatpush1.bf16.msra.mxu1 %v4107_v11  ;;  %v4158_v10 = vld [vmem:[%s5687_s5] ss:$12 sps:$4 sm:$0xff]   ;;  %v599_v11 = vpack.c.bf16 %v595_v5, %v595_v5 }
 0x247   :  { %1298 = vmatprep.subr.bf16.mxu0 %v4112_v12  ;;  %1380 = vmatprep.subr.bf16.mxu1 %v4115_v13  ;;  %v4163_v12 = vld [vmem:[%s5687_s5 + $0x1c] ss:$12 sps:$4 sm:$0xff]   ;;  %v4161_v13 = vld [vmem:[%s5687_s5 + $0x18] ss:$12 sps:$4 sm:$0xff]  }
 0x24a   :  { %1299 = vmatpush1.bf16.msra.mxu0 %v4110_v15  ;;  %1381 = vmatpush1.bf16.msra.mxu1 %v4113_v17  ;;  %v4164_v15 = vld [vmem:[%s5687_s5 + $0x30] ss:$12 sps:$4 sm:$0xff]   ;;  %v4169_v17 = vld [vmem:[%s5687_s5 + $0x4c] ss:$12 sps:$4 sm:$0xff]  }
 0x24b   :  { %1300 = vmatprep.subr.bf16.mxu0 %v4118_v19  ;;  %1382 = vmatprep.subr.bf16.mxu1 %v4121_v22  ;;  %v4167_v19 = vld [vmem:[%s5687_s5 + $0x48] ss:$12 sps:$4 sm:$0xff]   ;;  %v4172_v22 = vld [vmem:[%s5687_s5 + $0x64] ss:$12 sps:$4 sm:$0xff]  }
 0x24e   :  { %1301 = vmatpush1.bf16.msra.mxu0 %v4116_v24  ;;  %1383 = vmatpush1.bf16.msra.mxu1 %v4119_v25  ;;  %v4175_v24 = vld [vmem:[%s5687_s5 + $0x7c] ss:$12 sps:$4 sm:$0xff]   ;;  %v4173_v25 = vld [vmem:[%s5687_s5 + $0x78] ss:$12 sps:$4 sm:$0xff]  }
 0x24f   :  { %1302 = vmatprep.subr.bf16.mxu0 %v4124_v27  ;;  %1384 = vmatprep.subr.bf16.mxu1 %v4127_v28  ;;  %v4176_v27 = vld [vmem:[%s5687_s5 + $0x90] ss:$12 sps:$4 sm:$0xff]   ;;  %v4181_v28 = vld [vmem:[%s5687_s5 + $0xac] ss:$12 sps:$4 sm:$0xff]  }
 0x252   :  { %1303 = vmatpush1.bf16.msra.mxu0 %v4122_v32  ;;  %1385 = vmatpush1.bf16.msra.mxu1 %v4125_v33  ;;  %v4185_v32 = vld [vmem:[%s5687_s5 + $0xc8] ss:$12 sps:$4 sm:$0xff]   ;;  %v4182_v33 = vld [vmem:[%s5687_s5 + $0xc0] ss:$12 sps:$4 sm:$0xff]  }
 0x253   :  { %1304 = vmatprep.subr.bf16.mxu0 %v4130_v34  ;;  %1386 = vmatprep.subr.bf16.mxu1 %v4133_v35  ;;  %v4186_v34 = vld [vmem:[%s5687_s5 + $0x8] ss:$12 sps:$4 sm:$0xff]  }
 0x254   :  { %v4189_v35 = vld [vmem:[%s5687_s5 + $0xdc] ss:$12 sps:$4 sm:$0xff]  }
 0x256   :  { %1305 = vmatpush1.bf16.msra.mxu0 %v4128_v40  ;;  %1387 = vmatpush1.bf16.msra.mxu1 %v4131_v41  ;;  %v4191_v40 = vld [vmem:[%s5687_s5 + $0x20] ss:$12 sps:$4 sm:$0xff]  }
 0x257   :  { %1306 = vmatprep.subr.bf16.mxu0 %v4136_v42  ;;  %1388 = vmatprep.subr.bf16.mxu1 %v4139_v43  ;;  %v4194_v41 = vld [vmem:[%s5687_s5 + $0xf4] ss:$12 sps:$4 sm:$0xff]   ;;  %v4195_v42 = vld [vmem:[%s5687_s5 + $0xf8] ss:$12 sps:$4 sm:$0xff]   ;;  %v4192_v43 = vld [vmem:[%s5687_s5 + $0xf0] ss:$12 sps:$4 sm:$0xff]  }
 0x25a   :  { %1307 = vmatpush1.bf16.msra.mxu0 %v4134_v46  ;;  %1389 = vmatpush1.bf16.msra.mxu1 %v4137_v47  ;;  %v4200_v46 = vld [vmem:[%s5687_s5 + $0x110] ss:$12 sps:$4 sm:$0xff]   ;;  %v4197_v47 = vld [vmem:[%s5687_s5 + $0x108] ss:$12 sps:$4 sm:$0xff]  }
 0x25b   :  { %1308 = vmatprep.subr.bf16.mxu0 %v4142_v48  ;;  %1390 = vmatprep.subr.bf16.mxu1 %v4145_v49  ;;  %v4201_v48 = vld [vmem:[%s5687_s5 + $0x50] ss:$12 sps:$4 sm:$0xff]   ;;  %v4202_v49 = vld [vmem:[%s5687_s5 + $0x120] ss:$12 sps:$4 sm:$0xff]  }
 0x25e   :  { %1309 = vmatpush1.bf16.msra.mxu0 %v4140_v52  ;;  %1391 = vmatpush1.bf16.msra.mxu1 %v4143_v53  ;;  %v4206_v52 = vld [vmem:[%s5687_s5 + $0x68] ss:$12 sps:$4 sm:$0xff]  }
 0x25f   :  { %1310 = vmatprep.subr.bf16.mxu0 %v4148_v54  ;;  %1392 = vmatprep.subr.bf16.mxu1 %v4151_v56  ;;  %v4209_v53 = vld [vmem:[%s5687_s5 + $0x13c] ss:$12 sps:$4 sm:$0xff]   ;;  %v4210_v54 = vld [vmem:[%s5687_s5 + $0x140] ss:$12 sps:$4 sm:$0xff]   ;;  %v4207_v56 = vld [vmem:[%s5687_s5 + $0x138] ss:$12 sps:$4 sm:$0xff]  }
 0x262   :  { %1311 = vmatpush1.bf16.msra.mxu0 %v4146_v60  ;;  %1393 = vmatpush1.bf16.msra.mxu1 %v4149_v61  ;;  %v4215_v60 = vld [vmem:[%s5687_s5 + $0x158] ss:$12 sps:$4 sm:$0xff]   ;;  %v4212_v61 = vld [vmem:[%s5687_s5 + $0x150] ss:$12 sps:$4 sm:$0xff]  }
 0x263   :  { %1312 = vmatprep.subr.bf16.mxu0 %v4154_v62  ;;  %1394 = vmatprep.subr.bf16.mxu1 %v4157_v63  ;;  %v4216_v62 = vld [vmem:[%s5687_s5 + $0x98] ss:$12 sps:$4 sm:$0xff]  }
 0x264   :  { %v4219_v63 = vld [vmem:[%s5687_s5 + $0x16c] ss:$12 sps:$4 sm:$0xff]  }
 0x266   :  { %1313 = vmatpush1.bf16.msra.mxu0 %v4152_v1  ;;  %1395 = vmatpush1.bf16.msra.mxu1 %v4155_v2  ;;  %v4217_v1 = vld [vmem:[%s5687_s5 + $0x168] ss:$12 sps:$4 sm:$0xff]   ;;  %v4221_v2 = vld [vmem:[%s5687_s5 + $0xb0] ss:$12 sps:$4 sm:$0xff]  }
 0x267   :  { %2234 = vmatprep.subr.bf16.mxu0 %v4160_v4  ;;  %3787 = vmatprep.subr.bf16.mxu1 %v4185_v32  ;;  %v4225_v4 = vld [vmem:[%s5687_s5 + $0x248] ss:$12 sps:$4 sm:$0xff]  }
 0x269   :  { %1315 = vmatmul.mubr.bf16.vlgmr.msra.gmra.mrb[8].mxu0 %v599_v11  ;;  %1397 = vmatmul.mubr.bf16.vlgmr.msra.gmra.mrb[8].mxu1 %v599_v11 }
 0x26a   :  { %2235 = vmatpush1.bf16.msra.mxu0 %v4158_v10  ;;  %3788 = vmatpush3.bf16.msra.mxu1 %v4186_v34 }
 0x26b   :  { %2236 = vmatprep.subr.bf16.mxu0 %v4163_v12  ;;  %3789 = vmatprep.subr.bf16.mxu1 %v4190_v36 }
 0x26e   :  { %2237 = vmatpush1.bf16.msra.mxu0 %v4161_v13  ;;  %3790 = vmatpush3.bf16.msra.mxu1 %v4191_v40 }
 0x26f   :  { %2238 = vmatprep.subr.bf16.mxu0 %v4166_v14  ;;  %3791 = vmatprep.subr.bf16.mxu1 %v4195_v42  ;;  %v5178_v42 = vsub.s32 5, %v4568_v20 }
 0x272   :  { %2239 = vmatpush1.bf16.msra.mxu0 %v4164_v15  ;;  %3792 = vmatpush3.bf16.msra.mxu1 %v4196_v44  ;;  %v1456_v44 = vrot.slane %v4784_v7, %v4580_v55 }
 0x273   :  { %2240 = vmatprep.subr.bf16.mxu0 %v4169_v17  ;;  %3793 = vmatprep.subr.bf16.mxu1 %v4200_v46 }
 0x276   :  { %2241 = vmatpush1.bf16.msra.mxu0 %v4167_v19  ;;  %3794 = vmatpush3.bf16.msra.mxu1 %v4201_v48  ;;  %v5189_v48 = vsub.s32 6, %v4568_v20 }
 0x277   :  { %2242 = vmatprep.subr.bf16.mxu0 %v4172_v22  ;;  %3795 = vmatprep.subr.bf16.mxu1 %v4205_v51 }
 0x27a   :  { %2243 = vmatpush1.bf16.msra.mxu0 %v4170_v23  ;;  %3796 = vmatpush3.bf16.msra.mxu1 %v4206_v52  ;;  %v1476_v52 = vrot.slane %v1456_v44, %v4580_v55  ;;  %v4241_v44 = vld [vmem:[%s5687_s5 + $0x1d0] ss:$12 sps:$4 sm:$0xff]  }
 0x27b   :  { %2244 = vmatprep.subr.bf16.mxu0 %v4175_v24  ;;  %3797 = vmatprep.subr.bf16.mxu1 %v4210_v54  ;;  %v1524_v54 = vrot.slane %v4784_v7, %v4584_v57 }
 0x27e   :  { %2245 = vmatpush1.bf16.msra.mxu0 %v4173_v25  ;;  %3798 = vmatpush3.bf16.msra.mxu1 %v4211_v58  ;;  %v1528_v58 = vrot.slane %v4784_v7, %v5189_v48 }
 0x27f   :  { %2246 = vmatprep.subr.bf16.mxu0 %v4178_v26  ;;  %3799 = vmatprep.subr.bf16.mxu1 %v4215_v60 }
 0x282   :  { %2247 = vmatpush1.bf16.msra.mxu0 %v4176_v27  ;;  %3800 = vmatpush3.bf16.msra.mxu1 %v4216_v62 }
 0x283   :  { %2248 = vmatprep.subr.bf16.mxu0 %v4181_v28  ;;  %3801 = vmatprep.subr.bf16.mxu1 %v4220_v18 }
 0x286   :  { %2249 = vmatpush1.bf16.msra.mxu0 %v4179_v29  ;;  %3802 = vmatpush3.bf16.msra.mxu1 %v4221_v2 }
 0x287   :  { %2250 = vmatprep.subr.bf16.mxu0 %v4184_v30  ;;  %3809 = vmatprep.subr.bf16.mxu1 %v4225_v4 }
 0x28a   :  { %2251 = vmatpush1.bf16.msra.mxu0 %v4182_v33 }
 0x28b   :  { %2252 = vmatprep.subr.bf16.mxu0 %v4189_v35 }
 0x28e   :  { %2253 = vmatpush1.bf16.msra.mxu0 %v4187_v39 }
 0x28f   :  { %2254 = vmatprep.subr.bf16.mxu0 %v4194_v41 }
 0x292   :  { %2255 = vmatpush1.bf16.msra.mxu0 %v4192_v43 }
 0x293   :  { %2256 = vmatprep.subr.bf16.mxu0 %v4199_v45 }
 0x296   :  { %2257 = vmatpush1.bf16.msra.mxu0 %v4197_v47  ;;  %v1460_v47 = vrot.slane %v4784_v7, %v5178_v42  ;;  %v1548_v7 = vrot.slane %v1528_v58, %v4584_v57  ;;  %v4247_v58 = vld [vmem:[%s5687_s5 + $0x1f8] ss:$12 sps:$4 sm:$0xff]  }
 0x297   :  { %2258 = vmatprep.subr.bf16.mxu0 %v4204_v50  ;;  %v1468_v50 = vrot.slane %v4792_v9, %v5178_v42 }
 0x298   :  { %v1480_v20 = vrot.slane %v1460_v47, %v4580_v55  ;;  %v4245_v47 = vld [vmem:[%s5687_s5 + $0x2a8] ss:$12 sps:$4 sm:$0xff]  }
 0x29a   :  { %2259 = vmatpush1.bf16.msra.mxu0 %v4202_v49 }
 0x29b   :  { %2260 = vmatprep.subr.bf16.mxu0 %v4209_v53 }
 0x29e   :  { %2261 = vmatpush1.bf16.msra.mxu0 %v4207_v56 }
 0x29f   :  { %2262 = vmatprep.subr.bf16.mxu0 %v4214_v59 }
 0x2a2   :  { %2263 = vmatpush1.bf16.msra.mxu0 %v4212_v61  ;;  %v1536_v61 = vrot.slane %v4792_v9, %v5189_v48 }
 0x2a3   :  { %2264 = vmatprep.subr.bf16.mxu0 %v4219_v63 }
 0x2a6   :  { %2265 = vmatpush1.bf16.msra.mxu0 %v4217_v1 }
 0x2a7   :  { %2275 = vmatprep.subr.bf16.mxu0 %v4224_v3 }
 0x33c   :  { %v1316_v5 = vpop.f32.mrb[8].mxu0  ;;  %v1398_v10 = vpop.f32.mrb[8].mxu1 }
 0x33d   :  { %v1405_v11 = vmul.f32 0.0078125, %v1316_v5  ;;  %v1318_v12 = vpop.f32.mrb[9].mxu0  ;;  %v1400_v13 = vpop.f32.mrb[9].mxu1  ;;  %v5183_v45 = vmul.f32 0.0078125, %v1398_v10 }
 0x33e   :  { %v1406_v14 = vmul.f32 0.0078125, %v1318_v12  ;;  %v1408_v15 = vmul.f32 0.0078125, %v1400_v13  ;;  %v1320_v17 = vpop.f32.mrb[10].mxu0  ;;  %v1402_v19 = vpop.f32.mrb[10].mxu1 }
 0x33f   :  { %v1409_v22 = vmul.f32 %v1405_v11, %v1405_v11  ;;  %v1321_v23 = vpop.f32.mrb[11].mxu0  ;;  %v1403_v24 = vpop.f32.mrb[11].mxu1  ;;  %v1436_v43 = vrot.slane %v1405_v11, %v4571_v21  ;;  %v1411_v53 = vmul.f32 %v5183_v45, %v5183_v45 }
 0x340   :  { %v1410_v25 = vmul.f32 %v1406_v14, %v1406_v14  ;;  %v1412_v26 = vmul.f32 %v1408_v15, %v1408_v15  ;;  %v1440_v46 = vrot.slane %v1406_v14, %v4571_v21  ;;  %v1448_v49 = vrot.slane %v1408_v15, %v4571_v21  ;;  %v4222_v24 = vld [vmem:[%s5687_s5 + $0x180] ss:$12 sps:$4 sm:$0xff]  }
 0x341   :  { %v1417_v27 = vrot.slane %v1409_v22, 7  ;;  %v1449_v51 = vsub.f32 %v4805_v31, %v1436_v43  ;;  %v1488_v31 = vrot.slane %v1468_v50, %v4580_v55  ;;  %v1419_v63 = vrot.slane %v1411_v53, 7  ;;  %v4237_v43 = vld [vmem:[%s5687_s5 + $0x1c8] ss:$12 sps:$4 sm:$0xff]  }
 0x342   :  { %v1418_v28 = vrot.slane %v1410_v25, 7  ;;  %v1420_v29 = vrot.slane %v1412_v26, 7  ;;  %v1450_v56 = vsub.f32 %v4811_v37, %v1440_v46  ;;  %v1452_v60 = vsub.f32 %v4813_v38, %v1448_v49  ;;  %v4226_v25 = vld [vmem:[%s5687_s5 + $0x188] ss:$12 sps:$4 sm:$0xff]   ;;  %v4244_v46 = vld [vmem:[%s5687_s5 + $0x1e4] ss:$12 sps:$4 sm:$0xff]  }
 0x343   :  { %v1425_v30 = vsub.f32 %v1405_v11, %v1417_v27  ;;  %v1489_v62 = vmul.f32 %v1476_v52, %v1449_v51  ;;  %v1544_v37 = vrot.slane %v1524_v54, %v4584_v57  ;;  %v1556_v11 = vrot.slane %v1536_v61, %v4584_v57  ;;  %v4229_v27 = vld [vmem:[%s5687_s5 + $0x19c] ss:$12 sps:$4 sm:$0xff]   ;;  %v4242_v51 = vld [vmem:[%s5687_s5 + $0x1e0] ss:$12 sps:$4 sm:$0xff]  }
 0x344   :  { %v1426_v32 = vsub.f32 %v1406_v14, %v1418_v28  ;;  %v1428_v33 = vsub.f32 %v1408_v15, %v1420_v29  ;;  %v1490_v3 = vmul.f32 %v1480_v20, %v1450_v56  ;;  %v1492_v38 = vmul.f32 %v1488_v31, %v1452_v60  ;;  %v4230_v28 = vld [vmem:[%s5687_s5 + $0x260] ss:$12 sps:$4 sm:$0xff]   ;;  %v4246_v52 = vld [vmem:[%s5687_s5 + $0x1e8] ss:$12 sps:$4 sm:$0xff]  }
 0x345   :  { %v1429_v34 = vmax.f32 %v1425_v30, 0.0  ;;  %v1427_v12 = vsub.f32 %v5183_v45, %v1419_v63  ;;  %v1444_v49 = vrot.slane %v5183_v45, %v4571_v21  ;;  %v1464_v50 = vrot.slane %v4792_v9, %v4580_v55  ;;  %v4249_v53 = vld [vmem:[%s5687_s5 + $0x1fc] ss:$12 sps:$4 sm:$0xff]   ;;  %v4250_v45 = vld [vmem:[%s5687_s5 + $0x2c0] ss:$12 sps:$4 sm:$0xff]  }
 0x346   :  { %v1430_v35 = vmax.f32 %v1426_v32, 0.0  ;;  %v1432_v36 = vmax.f32 %v1428_v33, 0.0  ;;  %v4227_v32 = vld [vmem:[%s5687_s5 + $0x198] ss:$12 sps:$4 sm:$0xff]   ;;  %v4231_v33 = vld [vmem:[%s5687_s5 + $0x1a0] ss:$12 sps:$4 sm:$0xff]   ;;  %v1532_v61 = vrot.slane %v4792_v9, %v4584_v57 }
 0x347   :  { %v1493_v39 = vadd.f32 1e-05, %v1429_v34  ;;  %v1431_v22 = vmax.f32 %v1427_v12, 0.0  ;;  %v4234_v34 = vld [vmem:[%s5687_s5 + $0x1b4] ss:$12 sps:$4 sm:$0xff]   ;;  %v1451_v56 = vsub.f32 %v4917_v6, %v1444_v49  ;;  %v1484_v20 = vrot.slane %v1464_v50, %v4580_v55 }
 0x348   :  { %v1494_v40 = vadd.f32 1e-05, %v1430_v35  ;;  %v1496_v41 = vadd.f32 1e-05, %v1432_v36  ;;  %v4235_v35 = vld [vmem:[%s5687_s5 + $0x278] ss:$12 sps:$4 sm:$0xff]  }
 0x349   :  { %4382 = vrsqrt.f32 %v1493_v39  ;;  %v1495_v30 = vadd.f32 1e-05, %v1431_v22  ;;  %v4232_v36 = vld [vmem:[%s5687_s5 + $0x1b0] ss:$12 sps:$4 sm:$0xff]   ;;  %v4236_v39 = vld [vmem:[%s5687_s5 + $0x1b8] ss:$12 sps:$4 sm:$0xff]  }
 0x34a   :  { %4384 = vrsqrt.f32 %v1494_v40  ;;  %v4239_v40 = vld [vmem:[%s5687_s5 + $0x1cc] ss:$12 sps:$4 sm:$0xff]   ;;  %v4254_v60 = vld [vmem:[%s5687_s5 + $0x214] ss:$12 sps:$4 sm:$0xff]   ;;  %v4252_v63 = vld [vmem:[%s5687_s5 + $0x210] ss:$12 sps:$4 sm:$0xff]  }
 0x34b   :  { %4386 = vrsqrt.f32 %v1496_v41  ;;  %v4240_v41 = vld [vmem:[%s5687_s5 + $0x290] ss:$12 sps:$4 sm:$0xff]   ;;  %v4255_v6 = vld [vmem:[%s5687_s5 + $0x2d8] ss:$12 sps:$4 sm:$0xff]   ;;  %v4274_v22 = vld [vmem:[%s5687_s5 + $0x2a0] ss:$12 sps:$4 sm:$0xff]  }
 0x34c   :  { %4388 = vrsqrt.f32 %v1495_v30  ;;  %v4260_v9 = vld [vmem:[%s5687_s5 + $0x2f0] ss:$12 sps:$4 sm:$0xff]   ;;  %v4265_v12 = vld [vmem:[%s5687_s5 + $0x258] ss:$12 sps:$4 sm:$0xff]   ;;  %v4307_v50 = vld [vmem:[%s5691_s9 + $0xa8] ss:$12 sps:$4 sm:$0xff]  }
 0x34d   :  { %v4288_v30 = vld [vmem:[%s5691_s9 + $0x4] ss:$12 sps:$4 sm:$0xff]   ;;  %v4309_v49 = vld [vmem:[%s5691_s9 + $0xac] ss:$12 sps:$4 sm:$0xff]  }
 0x353   :  { %v4383_v59 = vpop.eup %4382 }
 0x354   :  { %v1504_v18 = vrot.slane %v4383_v59, %v4580_v55  ;;  %v4385_v1 = vpop.eup %4384  ;;  %v4251_v59 = vld [vmem:[%s5687_s5 + $0x200] ss:$12 sps:$4 sm:$0xff]  }
 0x355   :  { %v4387_v2 = vpop.eup %4386  ;;  %v1508_v4 = vrot.slane %v4385_v1, %v4580_v55  ;;  %v4259_v1 = vld [vmem:[%s5687_s5 + $0x22c] ss:$12 sps:$4 sm:$0xff]  }
 0x356   :  { %v1517_v5 = vmul.f32 %v1504_v18, %v1489_v62  ;;  %v1516_v10 = vrot.slane %v4387_v2, %v4580_v55  ;;  %v4389_v54 = vpop.eup %4388  ;;  %v1491_v62 = vmul.f32 %v1484_v20, %v1451_v56  ;;  %v4256_v18 = vld [vmem:[%s5687_s5 + $0x218] ss:$12 sps:$4 sm:$0xff]   ;;  %v1552_v2 = vrot.slane %v1532_v61, %v4584_v57  ;;  %v4318_v56 = vld [vmem:[%s5691_s9 + $0xe0] ss:$12 sps:$4 sm:$0xff]  }
 0x357   :  { %v1518_v13 = vmul.f32 %v1508_v4, %v1490_v3  ;;  %v1512_v31 = vrot.slane %v4389_v54, %v4580_v55  ;;  %v4257_v3 = vld [vmem:[%s5687_s5 + $0x228] ss:$12 sps:$4 sm:$0xff]   ;;  %v4261_v4 = vld [vmem:[%s5687_s5 + $0x230] ss:$12 sps:$4 sm:$0xff]   ;;  %v4319_v20 = vld [vmem:[%s5691_s9 + $0x20] ss:$12 sps:$4 sm:$0xff]  }
 0x358   :  { %v1557_v14 = vadd.f32 %v1544_v37, %v1517_v5  ;;  %v1520_v15 = vmul.f32 %v1516_v10, %v1492_v38  ;;  %v4262_v38 = vld [vmem:[%s5687_s5 + $0x240] ss:$12 sps:$4 sm:$0xff]   ;;  %v4317_v54 = vld [vmem:[%s5691_s9 + $0xdc] ss:$12 sps:$4 sm:$0xff]  }
 0x359   :  { %v1558_v17 = vadd.f32 %v1548_v7, %v1518_v13  ;;  %v1519_v37 = vmul.f32 %v1512_v31, %v1491_v62  ;;  %v4264_v7 = vld [vmem:[%s5687_s5 + $0x244] ss:$12 sps:$4 sm:$0xff]   ;;  %v4270_v13 = vld [vmem:[%s5687_s5 + $0x274] ss:$12 sps:$4 sm:$0xff]   ;;  %v4327_v61 = vld [vmem:[%s5691_s9 + $0x10c] ss:$12 sps:$4 sm:$0xff]  }
 0x35a   :  { %v1560_v19 = vadd.f32 %v1556_v11, %v1520_v15  ;;  %v1689_v26 = vpack.c.bf16 %v1557_v14, %v1557_v14  ;;  %v4267_v11 = vld [vmem:[%s5687_s5 + $0x25c] ss:$12 sps:$4 sm:$0xff]   ;;  %v4273_v15 = vld [vmem:[%s5687_s5 + $0x28c] ss:$12 sps:$4 sm:$0xff]  }
 0x35b   :  { %v1690_v23 = vpack.c.bf16 %v1558_v17, %v1558_v17  ;;  %v1559_v5 = vadd.f32 %v1552_v2, %v1519_v37  ;;  %v4268_v14 = vld [vmem:[%s5687_s5 + $0x270] ss:$12 sps:$4 sm:$0xff]   ;;  %v4271_v17 = vld [vmem:[%s5687_s5 + $0x288] ss:$12 sps:$4 sm:$0xff]   ;;  %v4324_v31 = vld [vmem:[%s5691_s9 + $0x38] ss:$12 sps:$4 sm:$0xff]  }
 0x35c   :  { %v1692_v29 = vpack.c.bf16 %v1560_v19, %v1560_v19  ;;  %v4276_v19 = vld [vmem:[%s5687_s5 + $0x2a4] ss:$12 sps:$4 sm:$0xff]   ;;  %v4330_v37 = vld [vmem:[%s5691_s9 + $0x120] ss:$12 sps:$4 sm:$0xff]   ;;  %v4334_v2 = vld [vmem:[%s5691_s9 + $0x68] ss:$12 sps:$4 sm:$0xff]  }
 0x35d   :  { %2266 = vmatprep.mubr.bf16.mxu0 %v1690_v23  ;;  %2348 = vmatprep.mubr.bf16.mxu1 %v1690_v23  ;;  %v1691_v10 = vpack.c.bf16 %v1559_v5, %v1559_v5  ;;  %v4279_v23 = vld [vmem:[%s5687_s5 + $0x2bc] ss:$12 sps:$4 sm:$0xff]   ;;  %v4339_v5 = vld [vmem:[%s5691_s9 + $0x80] ss:$12 sps:$4 sm:$0xff]  }
 0x35e   :  { %2267 = vmatmul.mubr.bf16.vlgmr.msra.gmra.mrb[12].mxu0 %v1689_v26  ;;  %2349 = vmatmul.mubr.bf16.vlgmr.msra.gmra.mrb[12].mxu1 %v1689_v26  ;;  %v4280_v26 = vld [vmem:[%s5687_s5 + $0x2d0] ss:$12 sps:$4 sm:$0xff]  }
 0x35f   :  { %2276 = vmatpush1.bf16.msra.mxu0 %v4222_v24  ;;  %3810 = vmatpush3.bf16.msra.mxu1 %v4226_v25  ;;  %v4277_v24 = vld [vmem:[%s5687_s5 + $0x2b8] ss:$12 sps:$4 sm:$0xff]   ;;  %v4282_v25 = vld [vmem:[%s5687_s5 + $0x2d4] ss:$12 sps:$4 sm:$0xff]   ;;  %v4328_v62 = vld [vmem:[%s5691_s9 + $0x110] ss:$12 sps:$4 sm:$0xff]  }
 0x360   :  { %2307 = vmatprep.mubr.bf16.mxu0 %v1692_v29  ;;  %2388 = vmatprep.mubr.bf16.mxu1 %v1692_v29  ;;  %v4286_v29 = vld [vmem:[%s5691_s9] ss:$12 sps:$4 sm:$0xff]  }
 0x361   :  { %2277 = vmatprep.subr.bf16.mxu0 %v4229_v27  ;;  %3811 = vmatprep.subr.bf16.mxu1 %v4230_v28  ;;  %v4285_v27 = vld [vmem:[%s5687_s5 + $0x2ec] ss:$12 sps:$4 sm:$0xff]   ;;  %v4283_v28 = vld [vmem:[%s5687_s5 + $0x2e8] ss:$12 sps:$4 sm:$0xff]  }
 0x363   :  { %2278 = vmatpush1.bf16.msra.mxu0 %v4227_v32  ;;  %3812 = vmatpush3.bf16.msra.mxu1 %v4231_v33  ;;  %v4291_v32 = vld [vmem:[%s5691_s9 + $0x1c] ss:$12 sps:$4 sm:$0xff]   ;;  %v4289_v33 = vld [vmem:[%s5691_s9 + $0x18] ss:$12 sps:$4 sm:$0xff]  }
 0x364   :  { %2279 = vmatprep.subr.bf16.mxu0 %v4234_v34  ;;  %3813 = vmatprep.subr.bf16.mxu1 %v4235_v35  ;;  %v4294_v34 = vld [vmem:[%s5691_s9 + $0x34] ss:$12 sps:$4 sm:$0xff]   ;;  %v4292_v35 = vld [vmem:[%s5691_s9 + $0x30] ss:$12 sps:$4 sm:$0xff]  }
 0x367   :  { %2280 = vmatpush1.bf16.msra.mxu0 %v4232_v36  ;;  %3814 = vmatpush3.bf16.msra.mxu1 %v4236_v39  ;;  %v4297_v36 = vld [vmem:[%s5691_s9 + $0x4c] ss:$12 sps:$4 sm:$0xff]   ;;  %v4295_v39 = vld [vmem:[%s5691_s9 + $0x48] ss:$12 sps:$4 sm:$0xff]  }
 0x368   :  { %2281 = vmatprep.subr.bf16.mxu0 %v4239_v40  ;;  %3815 = vmatprep.subr.bf16.mxu1 %v4240_v41  ;;  %v4300_v40 = vld [vmem:[%s5691_s9 + $0x64] ss:$12 sps:$4 sm:$0xff]   ;;  %v4298_v41 = vld [vmem:[%s5691_s9 + $0x60] ss:$12 sps:$4 sm:$0xff]  }
 0x36b   :  { %2282 = vmatpush1.bf16.msra.mxu0 %v4237_v43  ;;  %3816 = vmatpush3.bf16.msra.mxu1 %v4241_v44  ;;  %v4303_v43 = vld [vmem:[%s5691_s9 + $0x7c] ss:$12 sps:$4 sm:$0xff]   ;;  %v4301_v44 = vld [vmem:[%s5691_s9 + $0x78] ss:$12 sps:$4 sm:$0xff]  }
 0x36c   :  { %2283 = vmatprep.subr.bf16.mxu0 %v4244_v46  ;;  %3817 = vmatprep.subr.bf16.mxu1 %v4245_v47  ;;  %v4306_v46 = vld [vmem:[%s5691_s9 + $0x94] ss:$12 sps:$4 sm:$0xff]   ;;  %v4304_v47 = vld [vmem:[%s5691_s9 + $0x90] ss:$12 sps:$4 sm:$0xff]  }
 0x36f   :  { %2284 = vmatpush1.bf16.msra.mxu0 %v4242_v51  ;;  %3818 = vmatpush3.bf16.msra.mxu1 %v4246_v52  ;;  %v4312_v51 = vld [vmem:[%s5691_s9 + $0xc4] ss:$12 sps:$4 sm:$0xff]   ;;  %v4313_v52 = vld [vmem:[%s5691_s9 + $0xc8] ss:$12 sps:$4 sm:$0xff]  }
 0x370   :  { %2285 = vmatprep.subr.bf16.mxu0 %v4249_v53  ;;  %3819 = vmatprep.subr.bf16.mxu1 %v4250_v45  ;;  %v4310_v53 = vld [vmem:[%s5691_s9 + $0xc0] ss:$12 sps:$4 sm:$0xff]   ;;  %v4314_v45 = vld [vmem:[%s5691_s9 + $0x8] ss:$12 sps:$4 sm:$0xff]  }
 0x373   :  { %2286 = vmatpush1.bf16.msra.mxu0 %v4247_v58  ;;  %3820 = vmatpush3.bf16.msra.mxu1 %v4251_v59  ;;  %v4323_v58 = vld [vmem:[%s5691_s9 + $0xf8] ss:$12 sps:$4 sm:$0xff]  }
 0x374   :  { %2287 = vmatprep.subr.bf16.mxu0 %v4254_v60  ;;  %3821 = vmatprep.subr.bf16.mxu1 %v4255_v6  ;;  %v4315_v59 = vld [vmem:[%s5691_s9 + $0xd8] ss:$12 sps:$4 sm:$0xff]   ;;  %v4322_v60 = vld [vmem:[%s5691_s9 + $0xf4] ss:$12 sps:$4 sm:$0xff]   ;;  %v4320_v6 = vld [vmem:[%s5691_s9 + $0xf0] ss:$12 sps:$4 sm:$0xff]  }
 0x377   :  { %2288 = vmatpush1.bf16.msra.mxu0 %v4252_v63  ;;  %3822 = vmatpush3.bf16.msra.mxu1 %v4256_v18  ;;  %v4325_v63 = vld [vmem:[%s5691_s9 + $0x108] ss:$12 sps:$4 sm:$0xff]   ;;  %v4329_v18 = vld [vmem:[%s5691_s9 + $0x50] ss:$12 sps:$4 sm:$0xff]  }
 0x378   :  { %2289 = vmatprep.subr.bf16.mxu0 %v4259_v1  ;;  %3823 = vmatprep.subr.bf16.mxu1 %v4260_v9  ;;  %v4332_v1 = vld [vmem:[%s5691_s9 + $0x124] ss:$12 sps:$4 sm:$0xff]   ;;  %v4333_v9 = vld [vmem:[%s5691_s9 + $0x128] ss:$12 sps:$4 sm:$0xff]  }
 0x37b   :  { %2290 = vmatpush1.bf16.msra.mxu0 %v4257_v3  ;;  %3824 = vmatpush3.bf16.msra.mxu1 %v4261_v4  ;;  %v4337_v3 = vld [vmem:[%s5691_s9 + $0x13c] ss:$12 sps:$4 sm:$0xff]   ;;  %v4338_v4 = vld [vmem:[%s5691_s9 + $0x140] ss:$12 sps:$4 sm:$0xff]  }
 0x37c   :  { %2291 = vmatprep.subr.bf16.mxu0 %v4264_v7  ;;  %2810 = vmatprep.subr.bf16.mxu1 %v4288_v30  ;;  %v4335_v7 = vld [vmem:[%s5691_s9 + $0x138] ss:$12 sps:$4 sm:$0xff]  }
 0x37e   :  { %2389 = vmatmul.mubr.bf16.vlgmr.msra.gmra.mrb[16].mxu1 %v1691_v10 }
 0x37f   :  { %2292 = vmatpush1.bf16.msra.mxu0 %v4262_v38  ;;  %2811 = vmatpush1.bf16.msra.mxu1 %v4286_v29  ;;  %v4342_v38 = vld [vmem:[%s5691_s9 + $0x154] ss:$12 sps:$4 sm:$0xff]  }
 0x380   :  { %2293 = vmatprep.subr.bf16.mxu0 %v4267_v11  ;;  %2812 = vmatprep.subr.bf16.mxu1 %v4291_v32  ;;  %v4340_v11 = vld [vmem:[%s5691_s9 + $0x150] ss:$12 sps:$4 sm:$0xff]  }
 0x383   :  { %2294 = vmatpush1.bf16.msra.mxu0 %v4265_v12  ;;  %2813 = vmatpush1.bf16.msra.mxu1 %v4289_v33  ;;  %v4344_v12 = vld [vmem:[%s5691_s9 + $0x98] ss:$12 sps:$4 sm:$0xff]  }
 0x384   :  { %2295 = vmatprep.subr.bf16.mxu0 %v4270_v13  ;;  %2814 = vmatprep.subr.bf16.mxu1 %v4294_v34  ;;  %v4345_v13 = vld [vmem:[%s5691_s9 + $0x168] ss:$12 sps:$4 sm:$0xff]  }
 0x387   :  { %2296 = vmatpush1.bf16.msra.mxu0 %v4268_v14  ;;  %2815 = vmatpush1.bf16.msra.mxu1 %v4292_v35  ;;  %v4347_v14 = vld [vmem:[%s5691_s9 + $0x16c] ss:$12 sps:$4 sm:$0xff]  }
 0x388   :  { %2297 = vmatprep.subr.bf16.mxu0 %v4273_v15  ;;  %2816 = vmatprep.subr.bf16.mxu1 %v4297_v36  ;;  %v4348_v15 = vld [vmem:[%s5691_s9 + $0x170] ss:$12 sps:$4 sm:$0xff]  }
 0x38b   :  { %2298 = vmatpush1.bf16.msra.mxu0 %v4271_v17  ;;  %2817 = vmatpush1.bf16.msra.mxu1 %v4295_v39  ;;  %v4349_v17 = vld [vmem:[%s5691_s9 + $0xb0] ss:$12 sps:$4 sm:$0xff]  }
 0x38c   :  { %2299 = vmatprep.subr.bf16.mxu0 %v4276_v19  ;;  %2818 = vmatprep.subr.bf16.mxu1 %v4300_v40  ;;  %v4352_v19 = vld [vmem:[%s5691_s9 + $0x184] ss:$12 sps:$4 sm:$0xff]   ;;  %v5524_v40 = vld [vmem:[%s5689_s7 + $0x14] sm:$0x77] }
 0x38f   :  { %2300 = vmatpush1.bf16.msra.mxu0 %v4274_v22  ;;  %2819 = vmatpush1.bf16.msra.mxu1 %v4298_v41  ;;  %v1698_v41 = vrot.slane %v5524_v40, %v4571_v21 }
 0x390   :  { %2301 = vmatprep.subr.bf16.mxu0 %v4279_v23  ;;  %2820 = vmatprep.subr.bf16.mxu1 %v4303_v43  ;;  %v1702_v43 = vrot.slane %v5524_v40, %v4787_v8 }
 0x393   :  { %2302 = vmatpush1.bf16.msra.mxu0 %v4277_v24  ;;  %2821 = vmatpush1.bf16.msra.mxu1 %v4301_v44  ;;  %v1713_v44 = vrot.slane %v1698_v41, %v4571_v21  ;;  %v4350_v41 = vld [vmem:[%s5691_s9 + $0x180] ss:$12 sps:$4 sm:$0xff]  }
 0x394   :  { %2303 = vmatprep.subr.bf16.mxu0 %v4282_v25  ;;  %2822 = vmatprep.subr.bf16.mxu1 %v4306_v46  ;;  %v1717_v46 = vrot.slane %v1702_v43, %v4571_v21 }
 0x397   :  { %2304 = vmatpush1.bf16.msra.mxu0 %v4280_v26  ;;  %2823 = vmatpush1.bf16.msra.mxu1 %v4304_v47 }
 0x398   :  { %2305 = vmatprep.subr.bf16.mxu0 %v4285_v27  ;;  %2824 = vmatprep.subr.bf16.mxu1 %v4309_v49  ;;  %v5514_v27 = vld [vmem:[%s5689_s7 + $0x1c] sm:$0x7] }
 0x39b   :  { %2306 = vmatpush1.bf16.msra.mxu0 %v4283_v28  ;;  %2825 = vmatpush1.bf16.msra.mxu1 %v4307_v50  ;;  %v1706_v28 = vrot.slane %v5514_v27, %v4571_v21 }
 0x39c   :  { %2826 = vmatprep.subr.bf16.mxu1 %v4312_v51  ;;  %3831 = vmatprep.subr.bf16.mxu0 %v4313_v52 }
 0x39d   :  { %v1721_v29 = vrot.slane %v1706_v28, %v4571_v21 }
 0x39e   :  { %2308 = vmatmul.mubr.bf16.vlgmr.msra.gmra.mrb[12].mxu0 %v1691_v10  ;;  %v4343_v10 = vld [vmem:[%s5691_s9 + $0x158] ss:$12 sps:$4 sm:$0xff]  }
 0x39f   :  { %3832 = vmatpush3.bf16.msra.mxu0 %v4314_v45  ;;  %2827 = vmatpush1.bf16.msra.mxu1 %v4310_v53 }
 0x3a0   :  { %3833 = vmatprep.subr.bf16.mxu0 %v4318_v56  ;;  %2828 = vmatprep.subr.bf16.mxu1 %v4317_v54 }
 0x3a3   :  { %3834 = vmatpush3.bf16.msra.mxu0 %v4319_v20  ;;  %2829 = vmatpush1.bf16.msra.mxu1 %v4315_v59 }
 0x3a4   :  { %3835 = vmatprep.subr.bf16.mxu0 %v4323_v58  ;;  %2830 = vmatprep.subr.bf16.mxu1 %v4322_v60 }
 0x3a7   :  { %2831 = vmatpush1.bf16.msra.mxu1 %v4320_v6  ;;  %3836 = vmatpush3.bf16.msra.mxu0 %v4324_v31 }
 0x3a8   :  { %2832 = vmatprep.subr.bf16.mxu1 %v4327_v61  ;;  %3837 = vmatprep.subr.bf16.mxu0 %v4328_v62 }
 0x3ab   :  { %2833 = vmatpush1.bf16.msra.mxu1 %v4325_v63  ;;  %3838 = vmatpush3.bf16.msra.mxu0 %v4329_v18 }
 0x3ac   :  { %2834 = vmatprep.subr.bf16.mxu1 %v4332_v1  ;;  %3839 = vmatprep.subr.bf16.mxu0 %v4333_v9 }
 0x3af   :  { %2835 = vmatpush1.bf16.msra.mxu1 %v4330_v37  ;;  %3840 = vmatpush3.bf16.msra.mxu0 %v4334_v2 }
 0x3b0   :  { %2836 = vmatprep.subr.bf16.mxu1 %v4337_v3  ;;  %3841 = vmatprep.subr.bf16.mxu0 %v4338_v4 }
 0x3b3   :  { %2837 = vmatpush1.bf16.msra.mxu1 %v4335_v7  ;;  %3842 = vmatpush3.bf16.msra.mxu0 %v4339_v5 }
 0x3b4   :  { %2838 = vmatprep.subr.bf16.mxu1 %v4342_v38  ;;  %3843 = vmatprep.subr.bf16.mxu0 %v4343_v10 }
 0x3b7   :  { %2839 = vmatpush1.bf16.msra.mxu1 %v4340_v11  ;;  %3844 = vmatpush3.bf16.msra.mxu0 %v4344_v12 }
 0x3b8   :  { %2840 = vmatprep.subr.bf16.mxu1 %v4347_v14  ;;  %3845 = vmatprep.subr.bf16.mxu0 %v4348_v15 }
 0x3bb   :  { %2841 = vmatpush1.bf16.msra.mxu1 %v4345_v13  ;;  %3846 = vmatpush3.bf16.msra.mxu0 %v4349_v17 }
 0x3bc   :  { %3906 = vmatprep.subr.bf16.mxu0 %v4454_v0  ;;  %2851 = vmatprep.subr.bf16.mxu1 %v4352_v19 }
 0x431   :  { %v3803_v22 = vpop.f32.mrb[12].mxu1 }
 0x432   :  { %v3804_v23 = vpop.f32.mrb[13].mxu1 }
 0x433   :  { %v3805_v24 = vadd.f32 %v3804_v23, %v3803_v22  ;;  %v3806_v25 = vpop.f32.mrb[14].mxu1 }
 0x434   :  { %v3807_v26 = vpop.f32.mrb[15].mxu1 }
 0x435   :  { %v2351_v33 = vadd.f32 %v3805_v24, %v1721_v29 }
 0x451   :  { %v3825_v30 = vpop.f32.mrb[16].mxu1 }
 0x452   :  { %v3826_v32 = vpop.f32.mrb[17].mxu1 }
 0x453   :  { %v3827_v34 = vadd.f32 %v3826_v32, %v3825_v30  ;;  %v3828_v35 = vpop.f32.mrb[18].mxu1 }
 0x454   :  { %v3829_v36 = vpop.f32.mrb[19].mxu1 }
 0x455   :  { %v5519_v39 = vadd.f32 %v3827_v34, %v2351_v33 }
 0x457   :  { %v2491_v47 = vmul.f32 %v5519_v39, %v5519_v39  ;;  %v2482_v60 = vsel %vm186_vm5, %v5519_v39, 0.0 }
 0x458   :  { %v2483_v37 = vrot.slane %v2482_v60, 4 }
 0x459   :  { %v2506_v45 = vsel %vm186_vm5, %v2491_v47, 0.0 }
 0x45a   :  { %v2507_v61 = vrot.slane %v2506_v45, 4  ;;  %v2484_v13 = vadd.f32 %v2483_v37, %v2482_v60  ;;  %v4362_v60 = vld [vmem:[%s5688_s6 + $0x50] sm:$0xff]  }
 0x45b   :  { %v4371_v37 = vld [vmem:[%s5688_s6 + $0x30] sm:$0xff]  }
 0x45c   :  { %v2508_v5 = vadd.f32 %v2507_v61, %v2506_v45  ;;  %v2485_v25 = vrot.slane %v2484_v13, 2  ;;  %v4365_v61 = vld [vmem:[%s5688_s6 + $0x18] sm:$0xff]  }
 0x45e   :  { %v2509_v22 = vrot.slane %v2508_v5, 2  ;;  %v2486_v35 = vadd.f32 %v2485_v25, %v2484_v13 }
 0x460   :  { %v2510_v32 = vadd.f32 %v2509_v22, %v2508_v5  ;;  %v2487_v47 = vrot.slane %v2486_v35, 1 }
 0x471   :  { %v2309_v49 = vpop.f32.mrb[12].mxu0 }
 0x472   :  { %v5534_v50 = vadd.f32 %v2309_v49, %v1713_v44  ;;  %v2311_v51 = vpop.f32.mrb[13].mxu0  ;;  %v4355_v44 = vld [vmem:[%s5691_s9 + $0x19c] ss:$12 sps:$4 sm:$0xff]   ;;  %v4353_v49 = vld [vmem:[%s5691_s9 + $0x198] ss:$12 sps:$4 sm:$0xff]  }
 0x473   :  { %v5536_v52 = vadd.f32 %v2311_v51, %v1717_v46  ;;  %v2313_v53 = vpop.f32.mrb[14].mxu0  ;;  %v2511_v46 = vrot.slane %v2510_v32, 1 }
 0x474   :  { %v2468_v54 = vsel %vm84_vm1, %v5534_v50, 0.0  ;;  %v2489_v8 = vmul.f32 %v5534_v50, %v5534_v50  ;;  %v2314_v56 = vpop.f32.mrb[15].mxu0  ;;  %v2488_v53 = vadd.f32 %v2487_v47, %v2486_v35 }
 0x475   :  { %v2469_v20 = vrot.slane %v2468_v54, 4  ;;  %v2475_v58 = vsel %vm84_vm1, %v5536_v52, 0.0  ;;  %v2490_v59 = vmul.f32 %v5536_v52, %v5536_v52  ;;  %v2512_v51 = vadd.f32 %v2511_v46, %v2510_v32  ;;  %v4358_v56 = vld [vmem:[%s5688_s6 + $0x40] sm:$0xff]  }
 0x476   :  { %v2492_v6 = vsel %vm84_vm1, %v2489_v8, 0.0  ;;  %v2476_v31 = vrot.slane %v2475_v58, 4  ;;  %v3019_v32 = vrot.slane %v5514_v27, %v4580_v55 }
 0x477   :  { %v2470_v62 = vadd.f32 %v2469_v20, %v2468_v54  ;;  %v2493_v63 = vrot.slane %v2492_v6, 4  ;;  %v2499_v18 = vsel %vm84_vm1, %v2490_v59, 0.0  ;;  %v2515_v45 = vsel %vm592_vm10, %v2488_v53, %v2512_v51  ;;  %v4356_v54 = vld [vmem:[%s5691_s9 + $0x188] ss:$12 sps:$4 sm:$0xff]   ;;  %v4359_v20 = vld [vmem:[%s5688_s6] sm:$0xff]  }
 0x478   :  { %v2477_v1 = vadd.f32 %v2476_v31, %v2475_v58  ;;  %v2500_v9 = vrot.slane %v2499_v18, 4  ;;  %v2518_v8 = vpack.c.bf16 %v2515_v45, %v2515_v45  ;;  %v4360_v58 = vld [vmem:[%s5688_s6 + $0x48] sm:$0xff]   ;;  %v4364_v31 = vld [vmem:[%s5688_s6 + $0x58] sm:$0xff]   ;;  %v3034_v53 = vrot.slane %v3019_v32, %v4580_v55 }
 0x479   :  { %v2471_v2 = vrot.slane %v2470_v62, 2  ;;  %v2494_v3 = vadd.f32 %v2493_v63, %v2492_v6  ;;  %v4361_v59 = vld [vmem:[%s5688_s6 + $0x8] sm:$0xff]   ;;  %v4363_v6 = vld [vmem:[%s5688_s6 + $0x10] sm:$0xff]   ;;  %v4367_v63 = vld [vmem:[%s5688_s6 + $0x20] sm:$0xff]  }
 0x47a   :  { %v2478_v4 = vrot.slane %v2477_v1, 2  ;;  %v2501_v7 = vadd.f32 %v2500_v9, %v2499_v18  ;;  %v4368_v18 = vld [vmem:[%s5688_s6 + $0x68] sm:$0xff]   ;;  %v4370_v9 = vld [vmem:[%s5688_s6 + $0x70] sm:$0xff]  }
 0x47b   :  { %v2472_v38 = vadd.f32 %v2471_v2, %v2470_v62  ;;  %v2495_v10 = vrot.slane %v2494_v3, 2  ;;  %v4366_v62 = vld [vmem:[%s5688_s6 + $0x60] sm:$0xff]   ;;  %v4372_v2 = vld [vmem:[%s5688_s6 + $0x78] sm:$0xff]  }
 0x47c   :  { %v2479_v11 = vadd.f32 %v2478_v4, %v2477_v1  ;;  %v2502_v12 = vrot.slane %v2501_v7, 2  ;;  %v4369_v1 = vld [vmem:[%s5688_s6 + $0x28] sm:$0xff]   ;;  %v4374_v4 = vld [vmem:[%s5688_s6 + $0x80] sm:$0xff]  }
 0x47d   :  { %v2473_v14 = vrot.slane %v2472_v38, 1  ;;  %v2496_v15 = vadd.f32 %v2495_v10, %v2494_v3  ;;  %v4373_v3 = vld [vmem:[%s5688_s6 + $0x38] sm:$0xff]  }
 0x47e   :  { %v2480_v17 = vrot.slane %v2479_v11, 1  ;;  %v2503_v19 = vadd.f32 %v2502_v12, %v2501_v7  ;;  %v4375_v7 = vld [vmem:[%s5688_s6 + $0x88] sm:$0xff]  }
 0x47f   :  { %v2497_v23 = vrot.slane %v2496_v15, 1  ;;  %v2474_v26 = vadd.f32 %v2473_v14, %v2472_v38 }
 0x480   :  { %v2504_v24 = vrot.slane %v2503_v19, 1  ;;  %v2481_v29 = vadd.f32 %v2480_v17, %v2479_v11 }
 0x481   :  { %v2498_v28 = vadd.f32 %v2497_v23, %v2496_v15 }
 0x482   :  { %v2505_v30 = vadd.f32 %v2504_v24, %v2503_v19 }
 0x483   :  { %v2513_v33 = vsel %vm592_vm10, %v2474_v26, %v2498_v28 }
 0x484   :  { %v2514_v34 = vsel %vm592_vm10, %v2481_v29, %v2505_v30  ;;  %v2516_v43 = vpack.c.bf16 %v2513_v33, %v2513_v33 }
 0x485   :  { %v2517_v36 = vpack.c.bf16 %v2514_v34, %v2514_v34 }
 0x487   :  { %2842 = vmatprep.mubr.bf16.mxu1 %v2517_v36  ;;  %2924 = vmatprep.mubr.bf16.mxu0 %v2517_v36 }
 0x488   :  { %2843 = vmatmul.mubr.bf16.vlgmr.msra.gmra.mrb[20].mxu1 %v2516_v43  ;;  %2925 = vmatmul.mubr.bf16.vlgmr.msra.gmra.mrb[16].mxu0 %v2516_v43 }
 0x489   :  { %2852 = vmatpush1.bf16.msra.mxu1 %v4350_v41  ;;  %2883 = vmatprep.mubr.bf16.mxu1 %v4456_v16  ;;  %v4357_v16 = vld [vmem:[%s5691_s9 + $0x1a0] ss:$12 sps:$4 sm:$0xff]  }
 0x48a   :  { %2853 = vmatprep.subr.bf16.mxu1 %v4355_v44  ;;  %3910 = vmatprep.mubr.msk.bf16.mxu0 %vm4455_vm0, %v4454_v0 }
 0x48b   :  { %3907 = vmatpush3.bf16.msra.mxu0 %v4374_v4 }
 0x48c   :  { %3908 = vmatprep.subr.bf16.mxu0 %v4454_v0 }
 0x48d   :  { %2854 = vmatpush1.bf16.msra.mxu1 %v4353_v49 }
 0x48e   :  { %3898 = vmatprep.subr.bf16.mxu1 %v4454_v0 }
 0x48f   :  { %3909 = vmatpush3.bf16.msra.mxu0 %v4375_v7 }
 0x490   :  { %3914 = vmatprep.subr.bf16.mxu0 %v4454_v0 }
 0x494   :  { %3757 = vmatmul.mubr.msk.bf16.vlgmr.msra.gmra.mrb[20].mxu1 %vm306_vm6, %v2518_v8 }
 0x495   :  { %3899 = vmatpush3.bf16.msra.mxu1 %v4356_v54  ;;  %3902 = vmatprep.mubr.msk.bf16.mxu1 %vm4455_vm0, %v4454_v0 }
 0x496   :  { %3900 = vmatprep.subr.bf16.mxu1 %v4454_v0 }
 0x499   :  { %3901 = vmatpush3.bf16.msra.mxu1 %v4357_v16  ;;  %v3011_v16 = vrot.slane %v5524_v40, %v4580_v55 }
 0x49a   :  { %3856 = vmatprep.subr.bf16.mxu1 %v4358_v56 }
 0x49c   :  { %3903 = vmatmul.mubr.msk.bf16.vlgmr.msra.gmra.mrb[24].mxu1 %vm306_vm6, %v2518_v8 }
 0x49d   :  { %3857 = vmatpush3.bf16.msra.mxu1 %v4359_v20  ;;  %v3015_v20 = vrot.slane %v5524_v40, %v5178_v42 }
 0x49e   :  { %3858 = vmatprep.subr.bf16.mxu1 %v4360_v58 }
 0x4a1   :  { %3859 = vmatpush3.bf16.msra.mxu1 %v4361_v59 }
 0x4a2   :  { %3860 = vmatprep.subr.bf16.mxu1 %v4362_v60 }
 0x4a5   :  { %3861 = vmatpush3.bf16.msra.mxu1 %v4363_v6 }
 0x4a6   :  { %3862 = vmatprep.subr.bf16.mxu1 %v4364_v31  ;;  %v3026_v31 = vrot.slane %v3011_v16, %v4580_v55 }
 0x4a9   :  { %3863 = vmatpush3.bf16.msra.mxu1 %v4365_v61 }
 0x4aa   :  { %3864 = vmatprep.subr.bf16.mxu1 %v4366_v62  ;;  %v3030_v62 = vrot.slane %v3015_v20, %v4580_v55 }
 0x4ad   :  { %3865 = vmatpush3.bf16.msra.mxu1 %v4367_v63 }
 0x4ae   :  { %3866 = vmatprep.subr.bf16.mxu1 %v4368_v18  ;;  %v3066_v18 = vrot.slane %v5524_v40, %v5189_v48  ;;  %v3070_v48 = vrot.slane %v5514_v27, %v4584_v57 }
 0x4b0   :  { %v3081_v4 = vrot.slane %v3066_v18, %v4584_v57 }
 0x4b1   :  { %3867 = vmatpush3.bf16.msra.mxu1 %v4369_v1 }
 0x4b2   :  { %3868 = vmatprep.subr.bf16.mxu1 %v4370_v9 }
 0x4b5   :  { %3869 = vmatpush3.bf16.msra.mxu1 %v4371_v37 }
 0x4b6   :  { %3870 = vmatprep.subr.bf16.mxu1 %v4372_v2 }
 0x4b9   :  { %3871 = vmatpush3.bf16.msra.mxu1 %v4373_v3 }
 0x55b   :  { %v3847_v5 = vpop.f32.mrb[16].mxu0 }
 0x55c   :  { %v3848_v38 = vpop.f32.mrb[17].mxu0 }
 0x55d   :  { %v3849_v10 = vadd.f32 %v3848_v38, %v3847_v5  ;;  %v3850_v11 = vpop.f32.mrb[18].mxu0 }
 0x55e   :  { %v3851_v12 = vpop.f32.mrb[19].mxu0 }
 0x567   :  { %v2885_v13 = vpop.f32.mrb[20].mxu1 }
 0x568   :  { %v2972_v14 = vmul.f32 0.013888889, %v2885_v13  ;;  %v2887_v15 = vpop.f32.mrb[21].mxu1 }
 0x569   :  { %v2973_v17 = vmul.f32 0.013888889, %v2887_v15  ;;  %v2889_v19 = vpop.f32.mrb[22].mxu1 }
 0x56a   :  { %v2975_v22 = vmul.f32 %v2972_v14, %v2972_v14  ;;  %v2890_v23 = vpop.f32.mrb[23].mxu1  ;;  %v2996_v8 = vrot.slane %v2972_v14, %v4571_v21 }
 0x56b   :  { %v2976_v24 = vmul.f32 %v2973_v17, %v2973_v17  ;;  %v3000_v56 = vrot.slane %v2973_v17, %v4571_v21 }
 0x56c   :  { %v2981_v25 = vrot.slane %v2975_v22, 7  ;;  %v3005_v6 = vsub.f32 %v5534_v50, %v2996_v8 }
 0x56d   :  { %v2982_v26 = vrot.slane %v2976_v24, 7  ;;  %v3006_v61 = vsub.f32 %v5536_v52, %v3000_v56 }
 0x56e   :  { %v2987_v28 = vsub.f32 %v2972_v14, %v2981_v25  ;;  %v3035_v9 = vmul.f32 %v3026_v31, %v3005_v6  ;;  %v3085_v14 = vrot.slane %v3070_v48, %v4584_v57 }
 0x56f   :  { %v2988_v29 = vsub.f32 %v2973_v17, %v2982_v26  ;;  %v2966_v30 = vpop.f32.mrb[24].mxu1  ;;  %v3036_v2 = vmul.f32 %v3030_v62, %v3006_v61  ;;  %v4376_v26 = vld [vmem:[#allocation4] sm:$0xff]  }
 0x570   :  { %v2990_v33 = vmax.f32 %v2987_v28, 0.0  ;;  %v2967_v34 = vadd.f32 %v3849_v10, %v2966_v30  ;;  %v3904_v35 = vpop.f32.mrb[25].mxu1  ;;  %v4377_v28 = vld [vmem:[#allocation4 + $0x8] sm:$0xff]   ;;  %v4379_v30 = vld [vmem:[#allocation4 + $0x18] sm:$0xff]  }
 0x571   :  { %v2991_v36 = vmax.f32 %v2988_v29, 0.0  ;;  %v2969_v41 = vpop.f32.mrb[26].mxu1  ;;  %v4378_v29 = vld [vmem:[#allocation4 + $0x10] sm:$0xff]  }
 0x572   :  { %v3038_v43 = vadd.f32 1e-05, %v2990_v33  ;;  %v2974_v44 = vmul.f32 0.013888889, %v2967_v34  ;;  %v3905_v46 = vpop.f32.mrb[27].mxu1 }
 0x573   :  { %v3039_v47 = vadd.f32 1e-05, %v2991_v36  ;;  %v72_v33 = vld [vmem:[%s5689_s7 + $0x20] sm:$0x7] }
 0x574   :  { %4390 = vrsqrt.f32 %v3038_v43  ;;  %v2977_v49 = vmul.f32 %v2974_v44, %v2974_v44  ;;  %v3004_v51 = vrot.slane %v2974_v44, %v4571_v21  ;;  %v3140_v43 = vrot.slane %v72_v33, %v4571_v21 }
 0x575   :  { %4392 = vrsqrt.f32 %v3039_v47 }
 0x576   :  { %v2983_v45 = vrot.slane %v2977_v49, 7  ;;  %v3007_v54 = vsub.f32 %v5519_v39, %v3004_v51  ;;  %v3062_v39 = vrot.slane %v5524_v40, %v4584_v57 }
 0x578   :  { %v2989_v58 = vsub.f32 %v2974_v44, %v2983_v45  ;;  %v3037_v59 = vmul.f32 %v3034_v53, %v3007_v54  ;;  %v3077_v50 = vrot.slane %v3062_v39, %v4584_v57 }
 0x57a   :  { %v2992_v60 = vmax.f32 %v2989_v58, 0.0 }
 0x57c   :  { %v3040_v63 = vadd.f32 1e-05, %v2992_v60 }
 0x57e   :  { %v4391_v1 = vpop.eup %4390  ;;  %4394 = vrsqrt.f32 %v3040_v63 }
 0x57f   :  { %v4393_v42 = vpop.eup %4392  ;;  %v3047_v37 = vrot.slane %v4391_v1, %v4580_v55 }
 0x580   :  { %v3051_v3 = vrot.slane %v4393_v42, %v4580_v55 }
 0x581   :  { %v3056_v52 = vmul.f32 %v3047_v37, %v3035_v9 }
 0x582   :  { %v3057_v7 = vmul.f32 %v3051_v3, %v3036_v2 }
 0x583   :  { %v3086_v5 = vadd.f32 %v3077_v50, %v3056_v52  ;;  %v3441_v50 = vrot.slane %v72_v33, %v4580_v55 }
 0x584   :  { %v3087_v38 = vadd.f32 %v3081_v4, %v3057_v7 }
 0x585   :  { %vm3089_vm12 = vcmp.ge.f32.partialorder %v3086_v5, 0.0  ;;  %v3092_v40 = vmul.f32 0.2, %v3086_v5 }
 0x586   :  { %vm3090_vm13 = vcmp.ge.f32.partialorder %v3087_v38, 0.0  ;;  %v3093_v10 = vmul.f32 0.2, %v3087_v38 }
 0x587   :  { %v3095_v11 = vsel %vm3089_vm12, %v3086_v5, %v3092_v40 }
 0x588   :  { %v4395_v12 = vpop.eup %4394  ;;  %v3096_v13 = vsel %vm3090_vm13, %v3087_v38, %v3093_v10  ;;  %v3134_v19 = vpack.c.bf16 %v3095_v11, %v3095_v11  ;;  %v3453_v11 = vrot.slane %v72_v33, %v4584_v57 }
 0x589   :  { %v3055_v15 = vrot.slane %v4395_v12, %v4580_v55  ;;  %v3135_v17 = vpack.c.bf16 %v3096_v13, %v3096_v13 }
 0x58b   :  { %v3058_v22 = vmul.f32 %v3055_v15, %v3037_v59  ;;  %3284 = vmatprep.mubr.bf16.mxu1 %v3135_v17 }
 0x58c   :  { %3285 = vmatmul.mubr.bf16.vlgmr.msra.gmra.mrb[28].mxu1 %v3134_v19 }
 0x58d   :  { %v3088_v23 = vadd.f32 %v3085_v14, %v3058_v22 }
 0x58f   :  { %vm3091_vm14 = vcmp.ge.f32.partialorder %v3088_v23, 0.0  ;;  %v3094_v24 = vmul.f32 0.2, %v3088_v23 }
 0x591   :  { %v3097_v27 = vsel %vm3091_vm14, %v3088_v23, %v3094_v24 }
 0x592   :  { %v3136_v25 = vpack.c.bf16 %v3097_v27, %v3097_v27 }
 0x594   :  { %3911 = vmatmul.mubr.msk.bf16.vlgmr.msra.gmra.mrb[20].mxu0 %vm306_vm6, %v3136_v25 }
 0x595   :  { %3922 = vmatprep.mubr.msk.bf16.mxu0 %vm4455_vm0, %v4454_v0  ;;  %3915 = vmatpush3.bf16.msra.mxu0 %v4376_v26  ;;  %vm3382_vm0 = vcmask 523264  }
 0x596   :  { %3916 = vmatprep.subr.bf16.mxu0 %v4454_v0 }
 0x599   :  { %3917 = vmatpush3.bf16.msra.mxu0 %v4377_v28 }
 0x59a   :  { %3918 = vmatprep.subr.bf16.mxu0 %v4454_v0 }
 0x59d   :  { %3919 = vmatpush3.bf16.msra.mxu0 %v4378_v29 }
 0x59e   :  { %3920 = vmatprep.subr.bf16.mxu0 %v4454_v0 }
 0x5a1   :  { %3921 = vmatpush3.bf16.msra.mxu0 %v4379_v30 }
 0x65f   :  { %v3872_v32 = vpop.f32.mrb[28].mxu1 }
 0x660   :  { %v3873_v34 = vpop.f32.mrb[29].mxu1 }
 0x661   :  { %v3874_v35 = vadd.f32 %v3873_v34, %v3872_v32  ;;  %v3875_v36 = vpop.f32.mrb[30].mxu1 }
 0x662   :  { %v3876_v41 = vpop.f32.mrb[31].mxu1 }
 0x663   :  { %v3287_v44 = vadd.f32 %v3874_v35, %v3140_v43 }
 0x667   :  { %v3326_v46 = vpop.f32.mrb[20].mxu0 }
 0x668   :  { %v3327_v47 = vadd.f32 %v3326_v46, %v3287_v44  ;;  %v3912_v49 = vpop.f32.mrb[21].mxu0 }
 0x669   :  { %v3329_v51 = vpop.f32.mrb[22].mxu0 }
 0x66a   :  { %v3341_v0 = vsel %vm3340_vm15, %v3327_v47, 0.0  ;;  %v3348_v53 = vmul.f32 %v3327_v47, %v3327_v47  ;;  %v3913_v45 = vpop.f32.mrb[23].mxu0 }
 0x66b   :  { %v3342_v54 = vrot.slane %v3341_v0, 4 }
 0x66c   :  { %v3349_v8 = vsel %vm3340_vm15, %v3348_v53, 0.0 }
 0x66d   :  { %v3343_v16 = vadd.f32 %v3342_v54, %v3341_v0  ;;  %v3350_v56 = vrot.slane %v3349_v8, 4 }
 0x66f   :  { %v3344_v20 = vrot.slane %v3343_v16, 2  ;;  %v3351_v58 = vadd.f32 %v3350_v56, %v3349_v8 }
 0x671   :  { %v3345_v59 = vadd.f32 %v3344_v20, %v3343_v16  ;;  %v3352_v60 = vrot.slane %v3351_v58, 2 }
 0x673   :  { %v3346_v6 = vrot.slane %v3345_v59, 1  ;;  %v3353_v31 = vadd.f32 %v3352_v60, %v3351_v58 }
 0x675   :  { %v3354_v39 = vrot.slane %v3353_v31, 1  ;;  %v3347_v61 = vadd.f32 %v3346_v6, %v3345_v59 }
 0x677   :  { %v3355_v62 = vadd.f32 %v3354_v39, %v3353_v31 }
 0x679   :  { %v3356_v63 = vsel %vm592_vm10, %v3347_v61, %v3355_v62 }
 0x67a   :  { %v3357_v18 = vpack.c.bf16 %v3356_v63, %v3356_v63 }
 0x67c   :  { %3923 = vmatmul.mubr.msk.bf16.vlgmr.msra.gmra.mrb[24].mxu0 %vm3382_vm0, %v3357_v18 }
 0x74f   :  { %v3420_v1 = vpop.f32.mrb[24].mxu0 }
 0x750   :  { %v3426_v42 = vmul.f32 0.03125, %v3420_v1  ;;  %v3924_v9 = vpop.f32.mrb[25].mxu0 }
 0x751   :  { %v3423_v37 = vpop.f32.mrb[26].mxu0 }
 0x752   :  { %v3427_v2 = vmul.f32 %v3426_v42, %v3426_v42  ;;  %v3436_v3 = vrot.slane %v3426_v42, %v4571_v21  ;;  %v3925_v4 = vpop.f32.mrb[27].mxu0 }
 0x754   :  { %v3429_v52 = vrot.slane %v3427_v2, 7  ;;  %v3437_v7 = vsub.f32 %v3327_v47, %v3436_v3 }
 0x756   :  { %v3431_v5 = vsub.f32 %v3426_v42, %v3429_v52  ;;  %v3442_v38 = vmul.f32 %v3441_v50, %v3437_v7 }
 0x758   :  { %v3432_v48 = vmax.f32 %v3431_v5, 0.0 }
 0x75a   :  { %v3443_v40 = vadd.f32 1e-05, %v3432_v48 }
 0x75c   :  { %4396 = vrsqrt.f32 %v3443_v40 }
 0x766   :  { %v4397_v10 = vpop.eup %4396 }
 0x767   :  { %v3448_v12 = vrot.slane %v4397_v10, %v4580_v55 }
 0x769   :  { %v3449_v13 = vmul.f32 %v3448_v12, %v3442_v38 }
 0x76b   :  { %v3454_v14 = vadd.f32 %v3453_v11, %v3449_v13 }
 0x76d   :  { %vm3455_vm1 = vcmp.ge.f32.partialorder %v3454_v14, 0.0  ;;  %v3456_v15 = vmul.f32 0.2, %v3454_v14 }
 0x76f   :  { %v3457_v17 = vsel %vm3455_vm1, %v3454_v14, %v3456_v15 }
 0x770   :  { %4398 = vtanh.f32 %v3457_v17 }
 0x77a   :  { %v4399_v21 = vpop.eup %4398 }
 0x77b   :  { %3459 = vst.msk [vmem:[%s5693_s11] sm:$0x3] %vm3340_vm15, %v4399_v21 }
 0x77c   :  { %3464 = vsyncpa [#allocation3], 1 }
 0x77d   :  { %3465 = vsyncpa [#allocation5], 1 }

</bundles_post_ra>
